<compile_context>
chip_gen: v5e
topology: v5e:2x2
jax: 0.10.0
libtpu: 0.0.40
codegen_flags: <defaults>
</compile_context>

<pallas_src>
import functools
import math

import jax
import jax.numpy as jnp
import numpy as np
from jax.experimental import pallas as pl
from jax.experimental.pallas import tpu as pltpu

ED = 4            # embed dim (query / output)
EK = 6            # kdim = vdim for the cross attention
H = 2             # attention heads
DH = ED // H      # head dim = 2
LEAKY = 0.2
LN_EPS = 1e-5


# ----------------------------- kernel helpers --------------------------------

def _leaky(v):
    return jnp.where(v >= 0, v, LEAKY * v)


def _layernorm(v, g, b):
    mu = jnp.mean(v, axis=-1, keepdims=True)
    var = jnp.mean((v - mu) ** 2, axis=-1, keepdims=True)
    return (v - mu) * jax.lax.rsqrt(var + LN_EPS) * g + b


def _attend(q, k, v, n_batch, lq, lk):
    """Scaled-dot-product attention core.

    q: (n_batch*lq, H*DH) -- scale already folded into the q projection.
    k, v: (n_batch*lk, H*DH).  Returns concatenated heads: (n_batch*lq, H*DH).
    """
    outs = []
    for n in range(n_batch):                       # static batch loop
        qs = q[n * lq:(n + 1) * lq]
        ks = k[n * lk:(n + 1) * lk]
        vs = v[n * lk:(n + 1) * lk]
        head_outs = []
        for h in range(H):                         # static head loop
            qh = qs[:, h * DH:(h + 1) * DH]
            kh = ks[:, h * DH:(h + 1) * DH]
            vh = vs[:, h * DH:(h + 1) * DH]
            # scores (lq, lk): contract head dim (no explicit transpose)
            s = jax.lax.dot_general(qh, kh, (((1,), (1,)), ((), ())),
                                    preferred_element_type=jnp.float32)
            s = s - jnp.max(s, axis=-1, keepdims=True)
            p = jnp.exp(s)
            p = p / jnp.sum(p, axis=-1, keepdims=True)
            head_outs.append(jnp.dot(p, vh, preferred_element_type=jnp.float32))
        outs.append(jnp.concatenate(head_outs, axis=-1))   # (lq, H*DH)
    return jnp.concatenate(outs, axis=0)                   # (n_batch*lq, H*DH)


# ----------------------------- Pallas kernel ---------------------------------

def decode_kernel(xd_ref, xe_ref, w_ref, v_ref, out_ref, *,
                  n_batch, len_dec, len_enc):
    # xd_ref: (N*Ld, 4) decoder stream (batch folded into rows)
    # xe_ref: (N*Le, 6) encoder stream
    # w_ref : (8, 8, 16) packed (pre-transposed) weight matrices
    # v_ref : (12, 16)   packed biases / LayerNorm params
    xd = xd_ref[...]
    xe = xe_ref[...]

    # ---- packed weights (static slices of the slabs) ----
    w_qkv1 = w_ref[0, :ED, :3 * ED]     # (4, 12) fused qkv, q cols pre-scaled
    w_o1   = w_ref[1, :ED, :ED]
    w_q2   = w_ref[2, :ED, :ED]         # pre-scaled
    w_k2   = w_ref[3, :EK, :ED]
    w_v2   = w_ref[4, :EK, :ED]
    w_o2   = w_ref[5, :ED, :ED]
    w_l1   = w_ref[6, :ED, :ED]
    w_l2   = w_ref[7, :ED, :ED]

    b_qkv1 = v_ref[0:1, :3 * ED]
    b_o1   = v_ref[1:2, :ED]
    g1, bt1 = v_ref[2:3, :ED], v_ref[3:4, :ED]
    b_q2   = v_ref[4:5, 0:ED]
    b_k2   = v_ref[4:5, ED:2 * ED]
    b_v2   = v_ref[4:5, 2 * ED:3 * ED]
    b_o2   = v_ref[5:6, :ED]
    g2, bt2 = v_ref[6:7, :ED], v_ref[7:8, :ED]
    b_l1   = v_ref[8:9, :ED]
    b_l2   = v_ref[9:10, :ED]
    g3, bt3 = v_ref[10:11, :ED], v_ref[11:12, :ED]

    # ---- block 1: self-attention over the decoder stream ----
    qkv = jnp.dot(xd, w_qkv1, preferred_element_type=jnp.float32) + b_qkv1
    o1 = _attend(qkv[:, 0:ED], qkv[:, ED:2 * ED], qkv[:, 2 * ED:3 * ED],
                 n_batch, len_dec, len_dec)
    att1 = jnp.dot(o1, w_o1, preferred_element_type=jnp.float32) + b_o1
    # dropout -> identity (see TODO at top)
    n1 = _layernorm(_leaky(att1 + xd), g1, bt1)

    # ---- block 2: cross-attention against the encoder stream ----
    q2 = jnp.dot(n1, w_q2, preferred_element_type=jnp.float32) + b_q2
    k2 = jnp.dot(xe, w_k2, preferred_element_type=jnp.float32) + b_k2
    v2 = jnp.dot(xe, w_v2, preferred_element_type=jnp.float32) + b_v2
    o2 = _attend(q2, k2, v2, n_batch, len_dec, len_enc)
    att2 = jnp.dot(o2, w_o2, preferred_element_type=jnp.float32) + b_o2
    n2 = _layernorm(_leaky(att2 + n1), g2, bt2)

    # ---- block 3: 2-layer MLP ----
    y = _leaky(jnp.dot(n2, w_l1, preferred_element_type=jnp.float32) + b_l1)
    y = _leaky(jnp.dot(y, w_l2, preferred_element_type=jnp.float32) + b_l2)
    n3 = _layernorm(_leaky(y + n2), g3, bt3)

    out_ref[...] = n3


# --------------------------- parameters (glue) --------------------------------

def init_params(key):
    """PyTorch-shaped params for AttentionModuleDecode, deterministic."""
    ks = jax.random.split(key, 20)
    n = lambda k, shape, s=0.2: s * jax.random.normal(k, shape, jnp.float32)
    return dict(
        att1_in_w=n(ks[0], (3 * ED, ED)),      # MultiheadAttention in_proj_weight
        att1_in_b=n(ks[1], (3 * ED,), 0.1),
        att1_out_w=n(ks[2], (ED, ED)),
        att1_out_b=n(ks[3], (ED,), 0.1),
        ln1_g=1.0 + n(ks[4], (ED,), 0.05),
        ln1_b=n(ks[5], (ED,), 0.05),
        att2_q_w=n(ks[6], (ED, ED)),           # q_proj_weight
        att2_k_w=n(ks[7], (ED, EK)),           # k_proj_weight (kdim=6)
        att2_v_w=n(ks[8], (ED, EK)),           # v_proj_weight (vdim=6)
        att2_in_b=n(ks[9], (3 * ED,), 0.1),
        att2_out_w=n(ks[10], (ED, ED)),
        att2_out_b=n(ks[11], (ED,), 0.1),
        ln2_g=1.0 + n(ks[12], (ED,), 0.05),
        ln2_b=n(ks[13], (ED,), 0.05),
        lin1_w=n(ks[14], (ED, ED)),
        lin1_b=n(ks[15], (ED,), 0.1),
        lin2_w=n(ks[16], (ED, ED)),
        lin2_b=n(ks[17], (ED,), 0.1),
        ln3_g=1.0 + n(ks[18], (ED,), 0.05),
        ln3_b=n(ks[19], (ED,), 0.05),
    )


def pack_params(p):
    """Pack all parameters into two slabs (weights / vectors), pre-transposed
    into matmul-operand orientation, with the 1/sqrt(head_dim) softmax scale
    folded into the q projections."""
    scale = 1.0 / math.sqrt(DH)

    wqkv1_t = p['att1_in_w'].T                        # (4, 12) = [Wq^T | Wk^T | Wv^T]
    wqkv1_t = wqkv1_t.at[:, 0:ED].multiply(scale)     # fold scale into q columns
    mats = [
        (0, wqkv1_t),                                  # (4, 12)
        (1, p['att1_out_w'].T),                        # (4, 4)
        (2, p['att2_q_w'].T * scale),                  # (4, 4)
        (3, p['att2_k_w'].T),                          # (6, 4)
        (4, p['att2_v_w'].T),                          # (6, 4)
        (5, p['att2_out_w'].T),                        # (4, 4)
        (6, p['lin1_w'].T),                            # (4, 4)
        (7, p['lin2_w'].T),                            # (4, 4)
    ]
    wslab = jnp.zeros((8, 8, 16), jnp.float32)
    for i, m in mats:
        r, c = m.shape
        wslab = wslab.at[i, :r, :c].set(m)

    bqkv1 = p['att1_in_b'].at[0:ED].multiply(scale)
    bqkv2 = p['att2_in_b'].at[0:ED].multiply(scale)
    vecs = [
        (0, bqkv1), (1, p['att1_out_b']),
        (2, p['ln1_g']), (3, p['ln1_b']),
        (4, bqkv2), (5, p['att2_out_b']),
        (6, p['ln2_g']), (7, p['ln2_b']),
        (8, p['lin1_b']), (9, p['lin2_b']),
        (10, p['ln3_g']), (11, p['ln3_b']),
    ]
    vslab = jnp.zeros((12, 16), jnp.float32)
    for i, vec in vecs:
        vslab = vslab.at[i, :vec.shape[0]].set(vec)

    return wslab, vslab


# ------------------------------ wrapper ----------------------------------------

def decode_forward(enc_lne, dec_lnd, params):
    """enc_lne: (Le, N, 6), dec_lnd: (Ld, N, 4) -- PyTorch seq-first layout.
    Returns (Ld, N, 4)."""
    Le, N, _ = enc_lne.shape
    Ld = dec_lnd.shape[0]

    # Fold batch into rows (plain-JAX glue); one single-step pallas_call.
    xd = jnp.transpose(dec_lnd, (1, 0, 2)).reshape(N * Ld, ED).astype(jnp.float32)
    xe = jnp.transpose(enc_lne, (1, 0, 2)).reshape(N * Le, EK).astype(jnp.float32)
    wslab, vslab = pack_params(params)

    kernel = functools.partial(decode_kernel, n_batch=N, len_dec=Ld, len_enc=Le)

    out = pl.pallas_call(
        kernel,
        out_shape=jax.ShapeDtypeStruct((N * Ld, ED), jnp.float32),
        grid_spec=pltpu.PrefetchScalarGridSpec(
            num_scalar_prefetch=0,
            grid=(1,),                               # single step: no per-step overhead
            in_specs=[
                pl.BlockSpec((N * Ld, ED), lambda i: (0, 0)),
                pl.BlockSpec((N * Le, EK), lambda i: (0, 0)),
                pl.BlockSpec(wslab.shape, lambda i: (0, 0, 0)),
                pl.BlockSpec(vslab.shape, lambda i: (0, 0)),
            ],
            out_specs=pl.BlockSpec((N * Ld, ED), lambda i: (0, 0)),
        ),
        compiler_params=pltpu.CompilerParams(dimension_semantics=("arbitrary",)),
    )(xd, xe, wslab, vslab)

    return jnp.transpose(out.reshape(N, Ld, ED), (1, 0, 2))


# -------------------------- pure-JAX reference ----------------------------------

def _ref_ln(v, g, b):
    mu = jnp.mean(v, axis=-1, keepdims=True)
    var = jnp.mean((v - mu) ** 2, axis=-1, keepdims=True)
    return (v - mu) * jax.lax.rsqrt(var + LN_EPS) * g + b


def _ref_mha(q_in, k_in, v_in, wq, wk, wv, bq, bk, bv, wo, bo):
    # seq-first layout: q_in (Lq, N, 4); k_in/v_in (Lk, N, Ek)
    q = q_in @ wq.T + bq
    k = k_in @ wk.T + bk
    v = v_in @ wv.T + bv
    Lq, Nn, _ = q.shape
    Lk = k.shape[0]
    qh = q.reshape(Lq, Nn, H, DH).transpose(1, 2, 0, 3)   # (N, H, Lq, DH)
    kh = k.reshape(Lk, Nn, H, DH).transpose(1, 2, 0, 3)
    vh = v.reshape(Lk, Nn, H, DH).transpose(1, 2, 0, 3)
    s = jnp.einsum('nhqd,nhkd->nhqk', qh, kh) / math.sqrt(DH)
    a = jax.nn.softmax(s, axis=-1)
    o = jnp.einsum('nhqk,nhkd->nhqd', a, vh)
    o = o.transpose(2, 0, 1, 3).reshape(Lq, Nn, H * DH)
    return o @ wo.T + bo


def ref_forward(enc, dec, p):
    wq1 = p['att1_in_w'][0:ED]
    wk1 = p['att1_in_w'][ED:2 * ED]
    wv1 = p['att1_in_w'][2 * ED:3 * ED]
    bq1 = p['att1_in_b'][0:ED]
    bk1 = p['att1_in_b'][ED:2 * ED]
    bv1 = p['att1_in_b'][2 * ED:3 * ED]
    att1 = _ref_mha(dec, dec, dec, wq1, wk1, wv1, bq1, bk1, bv1,
                    p['att1_out_w'], p['att1_out_b'])
    n1 = _ref_ln(jax.nn.leaky_relu(att1 + dec, LEAKY), p['ln1_g'], p['ln1_b'])

    bq2 = p['att2_in_b'][0:ED]
    bk2 = p['att2_in_b'][ED:2 * ED]
    bv2 = p['att2_in_b'][2 * ED:3 * ED]
    att2 = _ref_mha(n1, enc, enc, p['att2_q_w'], p['att2_k_w'], p['att2_v_w'],
                    bq2, bk2, bv2, p['att2_out_w'], p['att2_out_b'])
    n2 = _ref_ln(jax.nn.leaky_relu(att2 + n1, LEAKY), p['ln2_g'], p['ln2_b'])

    y = jax.nn.leaky_relu(n2 @ p['lin1_w'].T + p['lin1_b'], LEAKY)
    y = jax.nn.leaky_relu(y @ p['lin2_w'].T + p['lin2_b'], LEAKY)
    n3 = _ref_ln(jax.nn.leaky_relu(y + n2, LEAKY), p['ln3_g'], p['ln3_b'])
    return n3


# --------------------------------- main -----------------------------------------

if __name__ == "__main__":
    key = jax.random.PRNGKey(0)
    k_enc, k_dec, k_p = jax.random.split(key, 3)

    Ld, Le, N = 8, 16, 2                  # dec seq=8, enc seq=16, batch=2
    dec = jax.random.normal(k_dec, (Ld, N, ED), jnp.float32)   # (L, N, 4) seq-first
    enc = jax.random.normal(k_enc, (Le, N, EK), jnp.float32)   # (L, N, 6) seq-first

    params = init_params(k_p)

    out = decode_forward(enc, dec, params)
    out = jax.block_until_ready(out)

    ref = ref_forward(enc, dec, params)
    assert out.shape == (Ld, N, ED)
    np.testing.assert_allclose(np.asarray(out), np.asarray(ref), rtol=2e-5, atol=2e-5)

    print("KERNEL_OK")
</pallas_src>

<mosaic_0001>
module attributes {stable_mosaic.version = 11 : i64} {
  func.func @decode_kernel(%arg0: i32, %arg1: memref<16x4xf32, #tpu.memory_space<vmem>>, %arg2: memref<32x6xf32, #tpu.memory_space<vmem>>, %arg3: memref<8x8x16xf32, #tpu.memory_space<vmem>>, %arg4: memref<12x16xf32, #tpu.memory_space<vmem>>, %arg5: memref<16x4xf32, #tpu.memory_space<vmem>>) attributes {dimension_semantics = [#tpu.dimension_semantics<arbitrary>], iteration_bounds = array<i64: 1>, scalar_prefetch = 0 : i64, scratch_operands = 0 : i64, tpu.core_type = #tpu.core_type<tc>, window_params = [{pipeline_mode = #tpu.pipeline_mode<synchronous>, transform_indices = @transform_0, window_bounds = array<i64: 16, 4>}, {pipeline_mode = #tpu.pipeline_mode<synchronous>, transform_indices = @transform_1, window_bounds = array<i64: 32, 6>}, {pipeline_mode = #tpu.pipeline_mode<synchronous>, transform_indices = @transform_2, window_bounds = array<i64: 8, 8, 16>}, {pipeline_mode = #tpu.pipeline_mode<synchronous>, transform_indices = @transform_3, window_bounds = array<i64: 12, 16>}, {pipeline_mode = #tpu.pipeline_mode<synchronous>, transform_indices = @transform_4, window_bounds = array<i64: 16, 4>}]} {
    %c0 = arith.constant 0 : index
    %c0_0 = arith.constant 0 : index
    %0 = vector.load %arg1[%c0, %c0_0] : memref<16x4xf32, #tpu.memory_space<vmem>>, vector<16x4xf32>
    %c0_1 = arith.constant 0 : index
    %c0_2 = arith.constant 0 : index
    %1 = vector.load %arg2[%c0_1, %c0_2] : memref<32x6xf32, #tpu.memory_space<vmem>>, vector<32x6xf32>
    %c0_3 = arith.constant 0 : index
    %c0_4 = arith.constant 0 : index
    %c0_5 = arith.constant 0 : index
    %2 = vector.load %arg3[%c0_3, %c0_4, %c0_5] : memref<8x8x16xf32, #tpu.memory_space<vmem>>, vector<1x4x12xf32>
    %3 = vector.shape_cast %2 : vector<1x4x12xf32> to vector<4x12xf32>
    %c1 = arith.constant 1 : index
    %c0_6 = arith.constant 0 : index
    %c0_7 = arith.constant 0 : index
    %4 = vector.load %arg3[%c1, %c0_6, %c0_7] : memref<8x8x16xf32, #tpu.memory_space<vmem>>, vector<1x4x4xf32>
    %5 = vector.shape_cast %4 : vector<1x4x4xf32> to vector<4x4xf32>
    %c2 = arith.constant 2 : index
    %c0_8 = arith.constant 0 : index
    %c0_9 = arith.constant 0 : index
    %6 = vector.load %arg3[%c2, %c0_8, %c0_9] : memref<8x8x16xf32, #tpu.memory_space<vmem>>, vector<1x4x4xf32>
    %7 = vector.shape_cast %6 : vector<1x4x4xf32> to vector<4x4xf32>
    %c3 = arith.constant 3 : index
    %c0_10 = arith.constant 0 : index
    %c0_11 = arith.constant 0 : index
    %8 = vector.load %arg3[%c3, %c0_10, %c0_11] : memref<8x8x16xf32, #tpu.memory_space<vmem>>, vector<1x6x4xf32>
    %9 = vector.shape_cast %8 : vector<1x6x4xf32> to vector<6x4xf32>
    %c4 = arith.constant 4 : index
    %c0_12 = arith.constant 0 : index
    %c0_13 = arith.constant 0 : index
    %10 = vector.load %arg3[%c4, %c0_12, %c0_13] : memref<8x8x16xf32, #tpu.memory_space<vmem>>, vector<1x6x4xf32>
    %11 = vector.shape_cast %10 : vector<1x6x4xf32> to vector<6x4xf32>
    %c5 = arith.constant 5 : index
    %c0_14 = arith.constant 0 : index
    %c0_15 = arith.constant 0 : index
    %12 = vector.load %arg3[%c5, %c0_14, %c0_15] : memref<8x8x16xf32, #tpu.memory_space<vmem>>, vector<1x4x4xf32>
    %13 = vector.shape_cast %12 : vector<1x4x4xf32> to vector<4x4xf32>
    %c6 = arith.constant 6 : index
    %c0_16 = arith.constant 0 : index
    %c0_17 = arith.constant 0 : index
    %14 = vector.load %arg3[%c6, %c0_16, %c0_17] : memref<8x8x16xf32, #tpu.memory_space<vmem>>, vector<1x4x4xf32>
    %15 = vector.shape_cast %14 : vector<1x4x4xf32> to vector<4x4xf32>
    %c7 = arith.constant 7 : index
    %c0_18 = arith.constant 0 : index
    %c0_19 = arith.constant 0 : index
    %16 = vector.load %arg3[%c7, %c0_18, %c0_19] : memref<8x8x16xf32, #tpu.memory_space<vmem>>, vector<1x4x4xf32>
    %17 = vector.shape_cast %16 : vector<1x4x4xf32> to vector<4x4xf32>
    %c0_20 = arith.constant 0 : index
    %c0_21 = arith.constant 0 : index
    %18 = vector.load %arg4[%c0_20, %c0_21] : memref<12x16xf32, #tpu.memory_space<vmem>>, vector<1x12xf32>
    %c1_22 = arith.constant 1 : index
    %c0_23 = arith.constant 0 : index
    %19 = vector.load %arg4[%c1_22, %c0_23] : memref<12x16xf32, #tpu.memory_space<vmem>>, vector<1x4xf32>
    %c2_24 = arith.constant 2 : index
    %c0_25 = arith.constant 0 : index
    %20 = vector.load %arg4[%c2_24, %c0_25] : memref<12x16xf32, #tpu.memory_space<vmem>>, vector<1x4xf32>
    %c3_26 = arith.constant 3 : index
    %c0_27 = arith.constant 0 : index
    %21 = vector.load %arg4[%c3_26, %c0_27] : memref<12x16xf32, #tpu.memory_space<vmem>>, vector<1x4xf32>
    %c4_28 = arith.constant 4 : index
    %c0_29 = arith.constant 0 : index
    %22 = vector.load %arg4[%c4_28, %c0_29] : memref<12x16xf32, #tpu.memory_space<vmem>>, vector<1x4xf32>
    %c4_30 = arith.constant 4 : index
    %c4_31 = arith.constant 4 : index
    %23 = vector.load %arg4[%c4_30, %c4_31] : memref<12x16xf32, #tpu.memory_space<vmem>>, vector<1x4xf32>
    %c4_32 = arith.constant 4 : index
    %c8 = arith.constant 8 : index
    %24 = vector.load %arg4[%c4_32, %c8] : memref<12x16xf32, #tpu.memory_space<vmem>>, vector<1x4xf32>
    %c5_33 = arith.constant 5 : index
    %c0_34 = arith.constant 0 : index
    %25 = vector.load %arg4[%c5_33, %c0_34] : memref<12x16xf32, #tpu.memory_space<vmem>>, vector<1x4xf32>
    %c6_35 = arith.constant 6 : index
    %c0_36 = arith.constant 0 : index
    %26 = vector.load %arg4[%c6_35, %c0_36] : memref<12x16xf32, #tpu.memory_space<vmem>>, vector<1x4xf32>
    %c7_37 = arith.constant 7 : index
    %c0_38 = arith.constant 0 : index
    %27 = vector.load %arg4[%c7_37, %c0_38] : memref<12x16xf32, #tpu.memory_space<vmem>>, vector<1x4xf32>
    %c8_39 = arith.constant 8 : index
    %c0_40 = arith.constant 0 : index
    %28 = vector.load %arg4[%c8_39, %c0_40] : memref<12x16xf32, #tpu.memory_space<vmem>>, vector<1x4xf32>
    %c9 = arith.constant 9 : index
    %c0_41 = arith.constant 0 : index
    %29 = vector.load %arg4[%c9, %c0_41] : memref<12x16xf32, #tpu.memory_space<vmem>>, vector<1x4xf32>
    %c10 = arith.constant 10 : index
    %c0_42 = arith.constant 0 : index
    %30 = vector.load %arg4[%c10, %c0_42] : memref<12x16xf32, #tpu.memory_space<vmem>>, vector<1x4xf32>
    %c11 = arith.constant 11 : index
    %c0_43 = arith.constant 0 : index
    %31 = vector.load %arg4[%c11, %c0_43] : memref<12x16xf32, #tpu.memory_space<vmem>>, vector<1x4xf32>
    %cst = arith.constant dense<0.000000e+00> : vector<16x12xf32>
    %32 = tpu.matmul %0, %3, %cst {dimension_numbers = #tpu.dot_dimension_numbers<[1], [0], [0], [1], [0, 0, 1, 1], [], []>} : vector<16x4xf32>, vector<4x12xf32>, vector<16x12xf32> -> vector<16x12xf32>
    %33 = vector.broadcast %18 : vector<1x12xf32> to vector<16x12xf32>
    %34 = arith.addf %32, %33 : vector<16x12xf32>
    %35 = vector.extract_strided_slice %34 {offsets = [0, 0], sizes = [16, 4], strides = [1, 1]} : vector<16x12xf32> to vector<16x4xf32>
    %36 = vector.extract_strided_slice %34 {offsets = [0, 4], sizes = [16, 4], strides = [1, 1]} : vector<16x12xf32> to vector<16x4xf32>
    %37 = vector.extract_strided_slice %34 {offsets = [0, 8], sizes = [16, 4], strides = [1, 1]} : vector<16x12xf32> to vector<16x4xf32>
    %38 = vector.extract_strided_slice %35 {offsets = [0, 0], sizes = [8, 4], strides = [1, 1]} : vector<16x4xf32> to vector<8x4xf32>
    %39 = vector.extract_strided_slice %36 {offsets = [0, 0], sizes = [8, 4], strides = [1, 1]} : vector<16x4xf32> to vector<8x4xf32>
    %40 = vector.extract_strided_slice %37 {offsets = [0, 0], sizes = [8, 4], strides = [1, 1]} : vector<16x4xf32> to vector<8x4xf32>
    %41 = vector.extract_strided_slice %38 {offsets = [0, 0], sizes = [8, 2], strides = [1, 1]} : vector<8x4xf32> to vector<8x2xf32>
    %42 = vector.extract_strided_slice %39 {offsets = [0, 0], sizes = [8, 2], strides = [1, 1]} : vector<8x4xf32> to vector<8x2xf32>
    %43 = vector.extract_strided_slice %40 {offsets = [0, 0], sizes = [8, 2], strides = [1, 1]} : vector<8x4xf32> to vector<8x2xf32>
    %cst_44 = arith.constant dense<0.000000e+00> : vector<8x8xf32>
    %44 = tpu.matmul %41, %42, %cst_44 {dimension_numbers = #tpu.dot_dimension_numbers<[1], [1], [0], [0], [0, 0, 1, 0], [], []>} : vector<8x2xf32>, vector<8x2xf32>, vector<8x8xf32> -> vector<8x8xf32>
    %cst_45 = arith.constant dense<0xFF800000> : vector<8xf32>
    %45 = vector.multi_reduction <maximumf>, %44, %cst_45 [1] : vector<8x8xf32> to vector<8xf32>
    %46 = vector.shape_cast %45 : vector<8xf32> to vector<8x1xf32>
    %47 = vector.broadcast %46 : vector<8x1xf32> to vector<8x8xf32>
    %48 = arith.subf %44, %47 : vector<8x8xf32>
    %49 = math.exp %48 : vector<8x8xf32>
    %cst_46 = arith.constant dense<0.000000e+00> : vector<8xf32>
    %50 = vector.multi_reduction <add>, %49, %cst_46 [1] : vector<8x8xf32> to vector<8xf32>
    %51 = vector.shape_cast %50 : vector<8xf32> to vector<8x1xf32>
    %52 = vector.broadcast %51 : vector<8x1xf32> to vector<8x8xf32>
    %53 = arith.divf %49, %52 : vector<8x8xf32>
    %cst_47 = arith.constant dense<0.000000e+00> : vector<8x2xf32>
    %54 = tpu.matmul %53, %43, %cst_47 {dimension_numbers = #tpu.dot_dimension_numbers<[1], [0], [0], [1], [0, 0, 1, 1], [], []>} : vector<8x8xf32>, vector<8x2xf32>, vector<8x2xf32> -> vector<8x2xf32>
    %55 = vector.extract_strided_slice %38 {offsets = [0, 2], sizes = [8, 2], strides = [1, 1]} : vector<8x4xf32> to vector<8x2xf32>
    %56 = vector.extract_strided_slice %39 {offsets = [0, 2], sizes = [8, 2], strides = [1, 1]} : vector<8x4xf32> to vector<8x2xf32>
    %57 = vector.extract_strided_slice %40 {offsets = [0, 2], sizes = [8, 2], strides = [1, 1]} : vector<8x4xf32> to vector<8x2xf32>
    %cst_48 = arith.constant dense<0.000000e+00> : vector<8x8xf32>
    %58 = tpu.matmul %55, %56, %cst_48 {dimension_numbers = #tpu.dot_dimension_numbers<[1], [1], [0], [0], [0, 0, 1, 0], [], []>} : vector<8x2xf32>, vector<8x2xf32>, vector<8x8xf32> -> vector<8x8xf32>
    %cst_49 = arith.constant dense<0xFF800000> : vector<8xf32>
    %59 = vector.multi_reduction <maximumf>, %58, %cst_49 [1] : vector<8x8xf32> to vector<8xf32>
    %60 = vector.shape_cast %59 : vector<8xf32> to vector<8x1xf32>
    %61 = vector.broadcast %60 : vector<8x1xf32> to vector<8x8xf32>
    %62 = arith.subf %58, %61 : vector<8x8xf32>
    %63 = math.exp %62 : vector<8x8xf32>
    %cst_50 = arith.constant dense<0.000000e+00> : vector<8xf32>
    %64 = vector.multi_reduction <add>, %63, %cst_50 [1] : vector<8x8xf32> to vector<8xf32>
    %65 = vector.shape_cast %64 : vector<8xf32> to vector<8x1xf32>
    %66 = vector.broadcast %65 : vector<8x1xf32> to vector<8x8xf32>
    %67 = arith.divf %63, %66 : vector<8x8xf32>
    %cst_51 = arith.constant dense<0.000000e+00> : vector<8x2xf32>
    %68 = tpu.matmul %67, %57, %cst_51 {dimension_numbers = #tpu.dot_dimension_numbers<[1], [0], [0], [1], [0, 0, 1, 1], [], []>} : vector<8x8xf32>, vector<8x2xf32>, vector<8x2xf32> -> vector<8x2xf32>
    %69 = tpu.concatenate %54, %68 in 1 : vector<8x2xf32>, vector<8x2xf32> -> vector<8x4xf32>
    %70 = vector.extract_strided_slice %35 {offsets = [8, 0], sizes = [8, 4], strides = [1, 1]} : vector<16x4xf32> to vector<8x4xf32>
    %71 = vector.extract_strided_slice %36 {offsets = [8, 0], sizes = [8, 4], strides = [1, 1]} : vector<16x4xf32> to vector<8x4xf32>
    %72 = vector.extract_strided_slice %37 {offsets = [8, 0], sizes = [8, 4], strides = [1, 1]} : vector<16x4xf32> to vector<8x4xf32>
    %73 = vector.extract_strided_slice %70 {offsets = [0, 0], sizes = [8, 2], strides = [1, 1]} : vector<8x4xf32> to vector<8x2xf32>
    %74 = vector.extract_strided_slice %71 {offsets = [0, 0], sizes = [8, 2], strides = [1, 1]} : vector<8x4xf32> to vector<8x2xf32>
    %75 = vector.extract_strided_slice %72 {offsets = [0, 0], sizes = [8, 2], strides = [1, 1]} : vector<8x4xf32> to vector<8x2xf32>
    %cst_52 = arith.constant dense<0.000000e+00> : vector<8x8xf32>
    %76 = tpu.matmul %73, %74, %cst_52 {dimension_numbers = #tpu.dot_dimension_numbers<[1], [1], [0], [0], [0, 0, 1, 0], [], []>} : vector<8x2xf32>, vector<8x2xf32>, vector<8x8xf32> -> vector<8x8xf32>
    %cst_53 = arith.constant dense<0xFF800000> : vector<8xf32>
    %77 = vector.multi_reduction <maximumf>, %76, %cst_53 [1] : vector<8x8xf32> to vector<8xf32>
    %78 = vector.shape_cast %77 : vector<8xf32> to vector<8x1xf32>
    %79 = vector.broadcast %78 : vector<8x1xf32> to vector<8x8xf32>
    %80 = arith.subf %76, %79 : vector<8x8xf32>
    %81 = math.exp %80 : vector<8x8xf32>
    %cst_54 = arith.constant dense<0.000000e+00> : vector<8xf32>
    %82 = vector.multi_reduction <add>, %81, %cst_54 [1] : vector<8x8xf32> to vector<8xf32>
    %83 = vector.shape_cast %82 : vector<8xf32> to vector<8x1xf32>
    %84 = vector.broadcast %83 : vector<8x1xf32> to vector<8x8xf32>
    %85 = arith.divf %81, %84 : vector<8x8xf32>
    %cst_55 = arith.constant dense<0.000000e+00> : vector<8x2xf32>
    %86 = tpu.matmul %85, %75, %cst_55 {dimension_numbers = #tpu.dot_dimension_numbers<[1], [0], [0], [1], [0, 0, 1, 1], [], []>} : vector<8x8xf32>, vector<8x2xf32>, vector<8x2xf32> -> vector<8x2xf32>
    %87 = vector.extract_strided_slice %70 {offsets = [0, 2], sizes = [8, 2], strides = [1, 1]} : vector<8x4xf32> to vector<8x2xf32>
    %88 = vector.extract_strided_slice %71 {offsets = [0, 2], sizes = [8, 2], strides = [1, 1]} : vector<8x4xf32> to vector<8x2xf32>
    %89 = vector.extract_strided_slice %72 {offsets = [0, 2], sizes = [8, 2], strides = [1, 1]} : vector<8x4xf32> to vector<8x2xf32>
    %cst_56 = arith.constant dense<0.000000e+00> : vector<8x8xf32>
    %90 = tpu.matmul %87, %88, %cst_56 {dimension_numbers = #tpu.dot_dimension_numbers<[1], [1], [0], [0], [0, 0, 1, 0], [], []>} : vector<8x2xf32>, vector<8x2xf32>, vector<8x8xf32> -> vector<8x8xf32>
    %cst_57 = arith.constant dense<0xFF800000> : vector<8xf32>
    %91 = vector.multi_reduction <maximumf>, %90, %cst_57 [1] : vector<8x8xf32> to vector<8xf32>
    %92 = vector.shape_cast %91 : vector<8xf32> to vector<8x1xf32>
    %93 = vector.broadcast %92 : vector<8x1xf32> to vector<8x8xf32>
    %94 = arith.subf %90, %93 : vector<8x8xf32>
    %95 = math.exp %94 : vector<8x8xf32>
    %cst_58 = arith.constant dense<0.000000e+00> : vector<8xf32>
    %96 = vector.multi_reduction <add>, %95, %cst_58 [1] : vector<8x8xf32> to vector<8xf32>
    %97 = vector.shape_cast %96 : vector<8xf32> to vector<8x1xf32>
    %98 = vector.broadcast %97 : vector<8x1xf32> to vector<8x8xf32>
    %99 = arith.divf %95, %98 : vector<8x8xf32>
    %cst_59 = arith.constant dense<0.000000e+00> : vector<8x2xf32>
    %100 = tpu.matmul %99, %89, %cst_59 {dimension_numbers = #tpu.dot_dimension_numbers<[1], [0], [0], [1], [0, 0, 1, 1], [], []>} : vector<8x8xf32>, vector<8x2xf32>, vector<8x2xf32> -> vector<8x2xf32>
    %101 = tpu.concatenate %86, %100 in 1 : vector<8x2xf32>, vector<8x2xf32> -> vector<8x4xf32>
    %102 = tpu.concatenate %69, %101 in 0 : vector<8x4xf32>, vector<8x4xf32> -> vector<16x4xf32>
    %cst_60 = arith.constant dense<0.000000e+00> : vector<16x4xf32>
    %103 = tpu.matmul %102, %5, %cst_60 {dimension_numbers = #tpu.dot_dimension_numbers<[1], [0], [0], [1], [0, 0, 1, 1], [], []>} : vector<16x4xf32>, vector<4x4xf32>, vector<16x4xf32> -> vector<16x4xf32>
    %104 = vector.broadcast %19 : vector<1x4xf32> to vector<16x4xf32>
    %105 = arith.addf %103, %104 : vector<16x4xf32>
    %106 = arith.addf %105, %0 : vector<16x4xf32>
    %cst_61 = arith.constant 0.000000e+00 : f32
    %107 = vector.broadcast %cst_61 : f32 to vector<16x4xf32>
    %108 = arith.cmpf oge, %106, %107 : vector<16x4xf32>
    %cst_62 = arith.constant 2.000000e-01 : f32
    %109 = vector.broadcast %cst_62 : f32 to vector<16x4xf32>
    %110 = arith.mulf %109, %106 : vector<16x4xf32>
    %111 = arith.select %108, %106, %110 : vector<16x4xi1>, vector<16x4xf32>
    %cst_63 = arith.constant dense<0.000000e+00> : vector<16xf32>
    %112 = vector.multi_reduction <add>, %111, %cst_63 [1] : vector<16x4xf32> to vector<16xf32>
    %113 = vector.shape_cast %112 : vector<16xf32> to vector<16x1xf32>
    %cst_64 = arith.constant 4.000000e+00 : f32
    %114 = vector.broadcast %cst_64 : f32 to vector<16x1xf32>
    %115 = arith.divf %113, %114 : vector<16x1xf32>
    %116 = vector.broadcast %115 : vector<16x1xf32> to vector<16x4xf32>
    %117 = arith.subf %111, %116 : vector<16x4xf32>
    %118 = arith.mulf %117, %117 : vector<16x4xf32>
    %cst_65 = arith.constant dense<0.000000e+00> : vector<16xf32>
    %119 = vector.multi_reduction <add>, %118, %cst_65 [1] : vector<16x4xf32> to vector<16xf32>
    %120 = vector.shape_cast %119 : vector<16xf32> to vector<16x1xf32>
    %cst_66 = arith.constant 4.000000e+00 : f32
    %121 = vector.broadcast %cst_66 : f32 to vector<16x1xf32>
    %122 = arith.divf %120, %121 : vector<16x1xf32>
    %123 = vector.broadcast %115 : vector<16x1xf32> to vector<16x4xf32>
    %124 = arith.subf %111, %123 : vector<16x4xf32>
    %cst_67 = arith.constant 9.99999974E-6 : f32
    %125 = vector.broadcast %cst_67 : f32 to vector<16x1xf32>
    %126 = arith.addf %122, %125 : vector<16x1xf32>
    %127 = math.rsqrt %126 : vector<16x1xf32>
    %128 = vector.broadcast %127 : vector<16x1xf32> to vector<16x4xf32>
    %129 = arith.mulf %124, %128 : vector<16x4xf32>
    %130 = vector.broadcast %20 : vector<1x4xf32> to vector<16x4xf32>
    %131 = arith.mulf %129, %130 : vector<16x4xf32>
    %132 = vector.broadcast %21 : vector<1x4xf32> to vector<16x4xf32>
    %133 = arith.addf %131, %132 : vector<16x4xf32>
    %cst_68 = arith.constant dense<0.000000e+00> : vector<16x4xf32>
    %134 = tpu.matmul %133, %7, %cst_68 {dimension_numbers = #tpu.dot_dimension_numbers<[1], [0], [0], [1], [0, 0, 1, 1], [], []>} : vector<16x4xf32>, vector<4x4xf32>, vector<16x4xf32> -> vector<16x4xf32>
    %135 = vector.broadcast %22 : vector<1x4xf32> to vector<16x4xf32>
    %136 = arith.addf %134, %135 : vector<16x4xf32>
    %cst_69 = arith.constant dense<0.000000e+00> : vector<32x4xf32>
    %137 = tpu.matmul %1, %9, %cst_69 {dimension_numbers = #tpu.dot_dimension_numbers<[1], [0], [0], [1], [0, 0, 1, 1], [], []>} : vector<32x6xf32>, vector<6x4xf32>, vector<32x4xf32> -> vector<32x4xf32>
    %138 = vector.broadcast %23 : vector<1x4xf32> to vector<32x4xf32>
    %139 = arith.addf %137, %138 : vector<32x4xf32>
    %cst_70 = arith.constant dense<0.000000e+00> : vector<32x4xf32>
    %140 = tpu.matmul %1, %11, %cst_70 {dimension_numbers = #tpu.dot_dimension_numbers<[1], [0], [0], [1], [0, 0, 1, 1], [], []>} : vector<32x6xf32>, vector<6x4xf32>, vector<32x4xf32> -> vector<32x4xf32>
    %141 = vector.broadcast %24 : vector<1x4xf32> to vector<32x4xf32>
    %142 = arith.addf %140, %141 : vector<32x4xf32>
    %143 = vector.extract_strided_slice %136 {offsets = [0, 0], sizes = [8, 4], strides = [1, 1]} : vector<16x4xf32> to vector<8x4xf32>
    %144 = vector.extract_strided_slice %139 {offsets = [0, 0], sizes = [16, 4], strides = [1, 1]} : vector<32x4xf32> to vector<16x4xf32>
    %145 = vector.extract_strided_slice %142 {offsets = [0, 0], sizes = [16, 4], strides = [1, 1]} : vector<32x4xf32> to vector<16x4xf32>
    %146 = vector.extract_strided_slice %143 {offsets = [0, 0], sizes = [8, 2], strides = [1, 1]} : vector<8x4xf32> to vector<8x2xf32>
    %147 = vector.extract_strided_slice %144 {offsets = [0, 0], sizes = [16, 2], strides = [1, 1]} : vector<16x4xf32> to vector<16x2xf32>
    %148 = vector.extract_strided_slice %145 {offsets = [0, 0], sizes = [16, 2], strides = [1, 1]} : vector<16x4xf32> to vector<16x2xf32>
    %cst_71 = arith.constant dense<0.000000e+00> : vector<8x16xf32>
    %149 = tpu.matmul %146, %147, %cst_71 {dimension_numbers = #tpu.dot_dimension_numbers<[1], [1], [0], [0], [0, 0, 1, 0], [], []>} : vector<8x2xf32>, vector<16x2xf32>, vector<8x16xf32> -> vector<8x16xf32>
    %cst_72 = arith.constant dense<0xFF800000> : vector<8xf32>
    %150 = vector.multi_reduction <maximumf>, %149, %cst_72 [1] : vector<8x16xf32> to vector<8xf32>
    %151 = vector.shape_cast %150 : vector<8xf32> to vector<8x1xf32>
    %152 = vector.broadcast %151 : vector<8x1xf32> to vector<8x16xf32>
    %153 = arith.subf %149, %152 : vector<8x16xf32>
    %154 = math.exp %153 : vector<8x16xf32>
    %cst_73 = arith.constant dense<0.000000e+00> : vector<8xf32>
    %155 = vector.multi_reduction <add>, %154, %cst_73 [1] : vector<8x16xf32> to vector<8xf32>
    %156 = vector.shape_cast %155 : vector<8xf32> to vector<8x1xf32>
    %157 = vector.broadcast %156 : vector<8x1xf32> to vector<8x16xf32>
    %158 = arith.divf %154, %157 : vector<8x16xf32>
    %cst_74 = arith.constant dense<0.000000e+00> : vector<8x2xf32>
    %159 = tpu.matmul %158, %148, %cst_74 {dimension_numbers = #tpu.dot_dimension_numbers<[1], [0], [0], [1], [0, 0, 1, 1], [], []>} : vector<8x16xf32>, vector<16x2xf32>, vector<8x2xf32> -> vector<8x2xf32>
    %160 = vector.extract_strided_slice %143 {offsets = [0, 2], sizes = [8, 2], strides = [1, 1]} : vector<8x4xf32> to vector<8x2xf32>
    %161 = vector.extract_strided_slice %144 {offsets = [0, 2], sizes = [16, 2], strides = [1, 1]} : vector<16x4xf32> to vector<16x2xf32>
    %162 = vector.extract_strided_slice %145 {offsets = [0, 2], sizes = [16, 2], strides = [1, 1]} : vector<16x4xf32> to vector<16x2xf32>
    %cst_75 = arith.constant dense<0.000000e+00> : vector<8x16xf32>
    %163 = tpu.matmul %160, %161, %cst_75 {dimension_numbers = #tpu.dot_dimension_numbers<[1], [1], [0], [0], [0, 0, 1, 0], [], []>} : vector<8x2xf32>, vector<16x2xf32>, vector<8x16xf32> -> vector<8x16xf32>
    %cst_76 = arith.constant dense<0xFF800000> : vector<8xf32>
    %164 = vector.multi_reduction <maximumf>, %163, %cst_76 [1] : vector<8x16xf32> to vector<8xf32>
    %165 = vector.shape_cast %164 : vector<8xf32> to vector<8x1xf32>
    %166 = vector.broadcast %165 : vector<8x1xf32> to vector<8x16xf32>
    %167 = arith.subf %163, %166 : vector<8x16xf32>
    %168 = math.exp %167 : vector<8x16xf32>
    %cst_77 = arith.constant dense<0.000000e+00> : vector<8xf32>
    %169 = vector.multi_reduction <add>, %168, %cst_77 [1] : vector<8x16xf32> to vector<8xf32>
    %170 = vector.shape_cast %169 : vector<8xf32> to vector<8x1xf32>
    %171 = vector.broadcast %170 : vector<8x1xf32> to vector<8x16xf32>
    %172 = arith.divf %168, %171 : vector<8x16xf32>
    %cst_78 = arith.constant dense<0.000000e+00> : vector<8x2xf32>
    %173 = tpu.matmul %172, %162, %cst_78 {dimension_numbers = #tpu.dot_dimension_numbers<[1], [0], [0], [1], [0, 0, 1, 1], [], []>} : vector<8x16xf32>, vector<16x2xf32>, vector<8x2xf32> -> vector<8x2xf32>
    %174 = tpu.concatenate %159, %173 in 1 : vector<8x2xf32>, vector<8x2xf32> -> vector<8x4xf32>
    %175 = vector.extract_strided_slice %136 {offsets = [8, 0], sizes = [8, 4], strides = [1, 1]} : vector<16x4xf32> to vector<8x4xf32>
    %176 = vector.extract_strided_slice %139 {offsets = [16, 0], sizes = [16, 4], strides = [1, 1]} : vector<32x4xf32> to vector<16x4xf32>
    %177 = vector.extract_strided_slice %142 {offsets = [16, 0], sizes = [16, 4], strides = [1, 1]} : vector<32x4xf32> to vector<16x4xf32>
    %178 = vector.extract_strided_slice %175 {offsets = [0, 0], sizes = [8, 2], strides = [1, 1]} : vector<8x4xf32> to vector<8x2xf32>
    %179 = vector.extract_strided_slice %176 {offsets = [0, 0], sizes = [16, 2], strides = [1, 1]} : vector<16x4xf32> to vector<16x2xf32>
    %180 = vector.extract_strided_slice %177 {offsets = [0, 0], sizes = [16, 2], strides = [1, 1]} : vector<16x4xf32> to vector<16x2xf32>
    %cst_79 = arith.constant dense<0.000000e+00> : vector<8x16xf32>
    %181 = tpu.matmul %178, %179, %cst_79 {dimension_numbers = #tpu.dot_dimension_numbers<[1], [1], [0], [0], [0, 0, 1, 0], [], []>} : vector<8x2xf32>, vector<16x2xf32>, vector<8x16xf32> -> vector<8x16xf32>
    %cst_80 = arith.constant dense<0xFF800000> : vector<8xf32>
    %182 = vector.multi_reduction <maximumf>, %181, %cst_80 [1] : vector<8x16xf32> to vector<8xf32>
    %183 = vector.shape_cast %182 : vector<8xf32> to vector<8x1xf32>
    %184 = vector.broadcast %183 : vector<8x1xf32> to vector<8x16xf32>
    %185 = arith.subf %181, %184 : vector<8x16xf32>
    %186 = math.exp %185 : vector<8x16xf32>
    %cst_81 = arith.constant dense<0.000000e+00> : vector<8xf32>
    %187 = vector.multi_reduction <add>, %186, %cst_81 [1] : vector<8x16xf32> to vector<8xf32>
    %188 = vector.shape_cast %187 : vector<8xf32> to vector<8x1xf32>
    %189 = vector.broadcast %188 : vector<8x1xf32> to vector<8x16xf32>
    %190 = arith.divf %186, %189 : vector<8x16xf32>
    %cst_82 = arith.constant dense<0.000000e+00> : vector<8x2xf32>
    %191 = tpu.matmul %190, %180, %cst_82 {dimension_numbers = #tpu.dot_dimension_numbers<[1], [0], [0], [1], [0, 0, 1, 1], [], []>} : vector<8x16xf32>, vector<16x2xf32>, vector<8x2xf32> -> vector<8x2xf32>
    %192 = vector.extract_strided_slice %175 {offsets = [0, 2], sizes = [8, 2], strides = [1, 1]} : vector<8x4xf32> to vector<8x2xf32>
    %193 = vector.extract_strided_slice %176 {offsets = [0, 2], sizes = [16, 2], strides = [1, 1]} : vector<16x4xf32> to vector<16x2xf32>
    %194 = vector.extract_strided_slice %177 {offsets = [0, 2], sizes = [16, 2], strides = [1, 1]} : vector<16x4xf32> to vector<16x2xf32>
    %cst_83 = arith.constant dense<0.000000e+00> : vector<8x16xf32>
    %195 = tpu.matmul %192, %193, %cst_83 {dimension_numbers = #tpu.dot_dimension_numbers<[1], [1], [0], [0], [0, 0, 1, 0], [], []>} : vector<8x2xf32>, vector<16x2xf32>, vector<8x16xf32> -> vector<8x16xf32>
    %cst_84 = arith.constant dense<0xFF800000> : vector<8xf32>
    %196 = vector.multi_reduction <maximumf>, %195, %cst_84 [1] : vector<8x16xf32> to vector<8xf32>
    %197 = vector.shape_cast %196 : vector<8xf32> to vector<8x1xf32>
    %198 = vector.broadcast %197 : vector<8x1xf32> to vector<8x16xf32>
    %199 = arith.subf %195, %198 : vector<8x16xf32>
    %200 = math.exp %199 : vector<8x16xf32>
    %cst_85 = arith.constant dense<0.000000e+00> : vector<8xf32>
    %201 = vector.multi_reduction <add>, %200, %cst_85 [1] : vector<8x16xf32> to vector<8xf32>
    %202 = vector.shape_cast %201 : vector<8xf32> to vector<8x1xf32>
    %203 = vector.broadcast %202 : vector<8x1xf32> to vector<8x16xf32>
    %204 = arith.divf %200, %203 : vector<8x16xf32>
    %cst_86 = arith.constant dense<0.000000e+00> : vector<8x2xf32>
    %205 = tpu.matmul %204, %194, %cst_86 {dimension_numbers = #tpu.dot_dimension_numbers<[1], [0], [0], [1], [0, 0, 1, 1], [], []>} : vector<8x16xf32>, vector<16x2xf32>, vector<8x2xf32> -> vector<8x2xf32>
    %206 = tpu.concatenate %191, %205 in 1 : vector<8x2xf32>, vector<8x2xf32> -> vector<8x4xf32>
    %207 = tpu.concatenate %174, %206 in 0 : vector<8x4xf32>, vector<8x4xf32> -> vector<16x4xf32>
    %cst_87 = arith.constant dense<0.000000e+00> : vector<16x4xf32>
    %208 = tpu.matmul %207, %13, %cst_87 {dimension_numbers = #tpu.dot_dimension_numbers<[1], [0], [0], [1], [0, 0, 1, 1], [], []>} : vector<16x4xf32>, vector<4x4xf32>, vector<16x4xf32> -> vector<16x4xf32>
    %209 = vector.broadcast %25 : vector<1x4xf32> to vector<16x4xf32>
    %210 = arith.addf %208, %209 : vector<16x4xf32>
    %211 = arith.addf %210, %133 : vector<16x4xf32>
    %cst_88 = arith.constant 0.000000e+00 : f32
    %212 = vector.broadcast %cst_88 : f32 to vector<16x4xf32>
    %213 = arith.cmpf oge, %211, %212 : vector<16x4xf32>
    %cst_89 = arith.constant 2.000000e-01 : f32
    %214 = vector.broadcast %cst_89 : f32 to vector<16x4xf32>
    %215 = arith.mulf %214, %211 : vector<16x4xf32>
    %216 = arith.select %213, %211, %215 : vector<16x4xi1>, vector<16x4xf32>
    %cst_90 = arith.constant dense<0.000000e+00> : vector<16xf32>
    %217 = vector.multi_reduction <add>, %216, %cst_90 [1] : vector<16x4xf32> to vector<16xf32>
    %218 = vector.shape_cast %217 : vector<16xf32> to vector<16x1xf32>
    %cst_91 = arith.constant 4.000000e+00 : f32
    %219 = vector.broadcast %cst_91 : f32 to vector<16x1xf32>
    %220 = arith.divf %218, %219 : vector<16x1xf32>
    %221 = vector.broadcast %220 : vector<16x1xf32> to vector<16x4xf32>
    %222 = arith.subf %216, %221 : vector<16x4xf32>
    %223 = arith.mulf %222, %222 : vector<16x4xf32>
    %cst_92 = arith.constant dense<0.000000e+00> : vector<16xf32>
    %224 = vector.multi_reduction <add>, %223, %cst_92 [1] : vector<16x4xf32> to vector<16xf32>
    %225 = vector.shape_cast %224 : vector<16xf32> to vector<16x1xf32>
    %cst_93 = arith.constant 4.000000e+00 : f32
    %226 = vector.broadcast %cst_93 : f32 to vector<16x1xf32>
    %227 = arith.divf %225, %226 : vector<16x1xf32>
    %228 = vector.broadcast %220 : vector<16x1xf32> to vector<16x4xf32>
    %229 = arith.subf %216, %228 : vector<16x4xf32>
    %cst_94 = arith.constant 9.99999974E-6 : f32
    %230 = vector.broadcast %cst_94 : f32 to vector<16x1xf32>
    %231 = arith.addf %227, %230 : vector<16x1xf32>
    %232 = math.rsqrt %231 : vector<16x1xf32>
    %233 = vector.broadcast %232 : vector<16x1xf32> to vector<16x4xf32>
    %234 = arith.mulf %229, %233 : vector<16x4xf32>
    %235 = vector.broadcast %26 : vector<1x4xf32> to vector<16x4xf32>
    %236 = arith.mulf %234, %235 : vector<16x4xf32>
    %237 = vector.broadcast %27 : vector<1x4xf32> to vector<16x4xf32>
    %238 = arith.addf %236, %237 : vector<16x4xf32>
    %cst_95 = arith.constant dense<0.000000e+00> : vector<16x4xf32>
    %239 = tpu.matmul %238, %15, %cst_95 {dimension_numbers = #tpu.dot_dimension_numbers<[1], [0], [0], [1], [0, 0, 1, 1], [], []>} : vector<16x4xf32>, vector<4x4xf32>, vector<16x4xf32> -> vector<16x4xf32>
    %240 = vector.broadcast %28 : vector<1x4xf32> to vector<16x4xf32>
    %241 = arith.addf %239, %240 : vector<16x4xf32>
    %cst_96 = arith.constant 0.000000e+00 : f32
    %242 = vector.broadcast %cst_96 : f32 to vector<16x4xf32>
    %243 = arith.cmpf oge, %241, %242 : vector<16x4xf32>
    %cst_97 = arith.constant 2.000000e-01 : f32
    %244 = vector.broadcast %cst_97 : f32 to vector<16x4xf32>
    %245 = arith.mulf %244, %241 : vector<16x4xf32>
    %246 = arith.select %243, %241, %245 : vector<16x4xi1>, vector<16x4xf32>
    %cst_98 = arith.constant dense<0.000000e+00> : vector<16x4xf32>
    %247 = tpu.matmul %246, %17, %cst_98 {dimension_numbers = #tpu.dot_dimension_numbers<[1], [0], [0], [1], [0, 0, 1, 1], [], []>} : vector<16x4xf32>, vector<4x4xf32>, vector<16x4xf32> -> vector<16x4xf32>
    %248 = vector.broadcast %29 : vector<1x4xf32> to vector<16x4xf32>
    %249 = arith.addf %247, %248 : vector<16x4xf32>
    %cst_99 = arith.constant 0.000000e+00 : f32
    %250 = vector.broadcast %cst_99 : f32 to vector<16x4xf32>
    %251 = arith.cmpf oge, %249, %250 : vector<16x4xf32>
    %cst_100 = arith.constant 2.000000e-01 : f32
    %252 = vector.broadcast %cst_100 : f32 to vector<16x4xf32>
    %253 = arith.mulf %252, %249 : vector<16x4xf32>
    %254 = arith.select %251, %249, %253 : vector<16x4xi1>, vector<16x4xf32>
    %255 = arith.addf %254, %238 : vector<16x4xf32>
    %cst_101 = arith.constant 0.000000e+00 : f32
    %256 = vector.broadcast %cst_101 : f32 to vector<16x4xf32>
    %257 = arith.cmpf oge, %255, %256 : vector<16x4xf32>
    %cst_102 = arith.constant 2.000000e-01 : f32
    %258 = vector.broadcast %cst_102 : f32 to vector<16x4xf32>
    %259 = arith.mulf %258, %255 : vector<16x4xf32>
    %260 = arith.select %257, %255, %259 : vector<16x4xi1>, vector<16x4xf32>
    %cst_103 = arith.constant dense<0.000000e+00> : vector<16xf32>
    %261 = vector.multi_reduction <add>, %260, %cst_103 [1] : vector<16x4xf32> to vector<16xf32>
    %262 = vector.shape_cast %261 : vector<16xf32> to vector<16x1xf32>
    %cst_104 = arith.constant 4.000000e+00 : f32
    %263 = vector.broadcast %cst_104 : f32 to vector<16x1xf32>
    %264 = arith.divf %262, %263 : vector<16x1xf32>
    %265 = vector.broadcast %264 : vector<16x1xf32> to vector<16x4xf32>
    %266 = arith.subf %260, %265 : vector<16x4xf32>
    %267 = arith.mulf %266, %266 : vector<16x4xf32>
    %cst_105 = arith.constant dense<0.000000e+00> : vector<16xf32>
    %268 = vector.multi_reduction <add>, %267, %cst_105 [1] : vector<16x4xf32> to vector<16xf32>
    %269 = vector.shape_cast %268 : vector<16xf32> to vector<16x1xf32>
    %cst_106 = arith.constant 4.000000e+00 : f32
    %270 = vector.broadcast %cst_106 : f32 to vector<16x1xf32>
    %271 = arith.divf %269, %270 : vector<16x1xf32>
    %272 = vector.broadcast %264 : vector<16x1xf32> to vector<16x4xf32>
    %273 = arith.subf %260, %272 : vector<16x4xf32>
    %cst_107 = arith.constant 9.99999974E-6 : f32
    %274 = vector.broadcast %cst_107 : f32 to vector<16x1xf32>
    %275 = arith.addf %271, %274 : vector<16x1xf32>
    %276 = math.rsqrt %275 : vector<16x1xf32>
    %277 = vector.broadcast %276 : vector<16x1xf32> to vector<16x4xf32>
    %278 = arith.mulf %273, %277 : vector<16x4xf32>
    %279 = vector.broadcast %30 : vector<1x4xf32> to vector<16x4xf32>
    %280 = arith.mulf %278, %279 : vector<16x4xf32>
    %281 = vector.broadcast %31 : vector<1x4xf32> to vector<16x4xf32>
    %282 = arith.addf %280, %281 : vector<16x4xf32>
    %c0_108 = arith.constant 0 : index
    %c0_109 = arith.constant 0 : index
    %283 = vector.load %arg5[%c0_108, %c0_109] : memref<16x4xf32, #tpu.memory_space<vmem>>, vector<16x4xf32>
    tpu.vector_store %arg5[%c0_108, %c0_109], %282 {strides = array<i32>} : memref<16x4xf32, #tpu.memory_space<vmem>>, vector<16x4xf32>,
    return
  }
  func.func @transform_0(%arg0: i32) -> (i32, i32) {
    %c0_i32 = arith.constant 0 : i32
    %c0_i32_0 = arith.constant 0 : i32
    %c0_i32_1 = arith.constant 0 : i32
    return %c0_i32, %c0_i32_0 : i32, i32
  }
  func.func @transform_1(%arg0: i32) -> (i32, i32) {
    %c0_i32 = arith.constant 0 : i32
    %c0_i32_0 = arith.constant 0 : i32
    %c0_i32_1 = arith.constant 0 : i32
    return %c0_i32, %c0_i32_0 : i32, i32
  }
  func.func @transform_2(%arg0: i32) -> (i32, i32, i32) {
    %c0_i32 = arith.constant 0 : i32
    %c0_i32_0 = arith.constant 0 : i32
    %c0_i32_1 = arith.constant 0 : i32
    %c0_i32_2 = arith.constant 0 : i32
    return %c0_i32, %c0_i32_0, %c0_i32_1 : i32, i32, i32
  }
  func.func @transform_3(%arg0: i32) -> (i32, i32) {
    %c0_i32 = arith.constant 0 : i32
    %c0_i32_0 = arith.constant 0 : i32
    %c0_i32_1 = arith.constant 0 : i32
    return %c0_i32, %c0_i32_0 : i32, i32
  }
  func.func @transform_4(%arg0: i32) -> (i32, i32) {
    %c0_i32 = arith.constant 0 : i32
    %c0_i32_0 = arith.constant 0 : i32
    %c0_i32_1 = arith.constant 0 : i32
    return %c0_i32, %c0_i32_0 : i32, i32
  }
}

</mosaic_0001>

<bundles_post_ra>
// kernel: tpu_custom_call.1
= control target key start
LH: loop header
LB: loop body
LE: loop exit
PB: predicated region body
PF: predicated region fallthrough
CT: control target
= control target key end

     0   :  { %9 = vsyncpa [#allocation3], 0  ;;  %s1371_s18 = smov [#allocation2]   ;;  %s1372_s20 = smov 128   ;;  %s1685_s0 = inlined_call_operand.vmem [shape: f32[16,4], index: 0, kind: input, shape index: {}]   ;;  %s1686_s1 = inlined_call_operand.vmem [shape: f32[32,6], index: 1, kind: input, shape index: {}]   ;;  %s1687_s2 = inlined_call_operand.hbm [shape: f32[8,8,16], index: 2, kind: input, shape index: {}]   ;;  %s1688_s3 = inlined_call_operand.vmem [shape: f32[12,16], index: 3, kind: input, shape index: {}]   ;;  %s1689_s4 = inlined_call_operand.vmem [shape: f32[16,4], index: 4, kind: output, shape index: {}]  }
   0x1   :  { %s18_s17 = sshll.u32 %s1687_s2, 4  ;;  %s20_s19 = sshll.u32 %s1371_s18, 4  ;;  %s19_s17 = int_to_ptr.hbm [resolvable:$true] %s18_s17  ;;  %s21_s19 = int_to_ptr.vmem [resolvable:$true] %s20_s19 }
   0x2   :  { %s1373_s21 = smov 8  }
   0x3   :  { %26 = dma.hbm_to_vmem [thread:$0]  %s19_s17, 1024, %s21_s19, [#allocation3], %s1372_s20, %s1372_s20, %s1373_s21  }
   0x4   :  { %1369 = dma.done.wait [#allocation3], 1024  }
   0x5   :  { %1370 = vsyncadd [#allocation3], 4294966272  ;;  %vm74_vm0 = vcmask 1043456   ;;  %vm67_vm1 = vcmask 31744   ;;  %v39_v0 = vld [vmem:[#allocation2] sm:$0xf] }
   0x6   :  { %v1412_v1 = vld [vmem:[%s1685_s0] sm:$0xff]  ;;  %v1417_v2 = vld [vmem:[%s1685_s0 + $0x8] sm:$0xff]  ;;  %1210 = vmatpush.msk.msra.mxu0 %vm74_vm0, %v39_v0  ;;  %1266 = vmatpush.msk.msra.mxu2 %vm74_vm0, %v39_v0  ;;  %s1374_s27 = smov 126   ;;  %s1375_s0 = smov 124   ;;  %vm104_vm2 = vcmask 15360   ;;  %vm129_vm3 = vcmask 64512  }
   0x7   :  { %1211 = vmatmul.msk.f32.vlgmr.msra.gmra.mxu0 %vm67_vm1, %v1412_v1  ;;  %1212 = vmatmul.msk.f32.vlgmr.msra.gmra.mxu2 %vm67_vm1, %v1417_v2  ;;  %v1287_v3 = vld [vmem:[%s1688_s3] ss:$0 sm:$0xff]  ;;  %s1376_s28 = smov 122   ;;  %s1377_s29 = smov 120  }
   0x8   :  { %s1378_s30 = smov 118   ;;  %s1379_s5 = smov 2  }
  0x84   :  { %v95_v4 = vpop.f32.mrf.mxu0 }
  0x85   :  { %v1428_v5 = vadd.f32 %v1287_v3, %v95_v4 }
  0x87   :  { %180 = vrot.lane.b32.xlu1 %v1428_v5, %s1374_s27  ;;  %102 = vrot.lane.b32.xlu0 %v1428_v5, %s1375_s0 }
  0x8a   :  { %v98_v6 = vpop.f32.mrf.mxu2 }
  0x8b   :  { %v1434_v7 = vadd.f32 %v1287_v3, %v98_v6 }
  0x8d   :  { %340 = vrot.lane.b32.xlu2 %v1434_v7, %s1374_s27 }
  0x8f   :  { %342 = vrot.lane.b32.xlu1 %v1434_v7, %s1376_s28  ;;  %182 = vrot.lane.b32.xlu0 %v1428_v5, %s1376_s28 }
  0x95   :  { %264 = vrot.lane.b32.xlu2 %v1434_v7, %s1375_s0 }
  0xe7   :  { %v341_v8 = vpop.permute.xlu2 %340 }
  0xef   :  { %v265_v9 = vpop.permute.xlu2 %264 }
  0xf9   :  { %v181_v10 = vpop.permute.xlu1 %180  ;;  %v103_v11 = vpop.permute.xlu0 %102 }
  0xfa   :  { %1213 = vmatpush.xpose.msk.msra.mxu1 %vm104_vm2, %v103_v11 }
  0xfd   :  { %1214 = vmatmul.msk.f32.vlgmr.msra.gmra.mxu1 %vm104_vm2, %v1428_v5 }
  0xfe   :  { %1219 = vmatpush.xpose.msk.msrb.mxu1 %vm104_vm2, %v265_v9 }
 0x101   :  { %v343_v12 = vpop.permute.xlu1 %342  ;;  %v183_v13 = vpop.permute.xlu0 %182 }
 0x102   :  { %1216 = vmatpush.xpose.msk.msra.mxu3 %vm104_vm2, %v183_v13  ;;  %1222 = vmatpush.xpose.msk.msrb.mxu0 %vm104_vm2, %v343_v12 }
 0x105   :  { %1217 = vmatmul.msk.f32.vlgmr.msra.gmra.mxu3 %vm104_vm2, %v181_v10  ;;  %1220 = vmatmul.msk.f32.vlgmr.msrb.gmra.mxu1 %vm104_vm2, %v1434_v7 }
 0x106   :  { %1223 = vmatmul.msk.f32.vlgmr.msrb.gmra.mxu0 %vm104_vm2, %v341_v8 }
 0x17a   :  { %v126_v14 = vpop.f32.mrf.mxu1 }
 0x17b   :  { %v130_v15 = vsel %vm129_vm3, %v126_v14, -inf }
 0x17c   :  { %131 = vmax.xlane.f32.xlu0 %v130_v15 }
 0x182   :  { %v287_v16 = vpop.f32.mrf.mxu1 }
 0x183   :  { %v365_v17 = vpop.f32.mrf.mxu0  ;;  %v290_v18 = vsel %vm129_vm3, %v287_v16, -inf }
 0x184   :  { %v368_v19 = vsel %vm129_vm3, %v365_v17, -inf  ;;  %291 = vmax.xlane.f32.xlu0 %v290_v18 }
 0x185   :  { %369 = vmax.xlane.f32.xlu2 %v368_v19 }
 0x188   :  { %v205_v20 = vpop.f32.mrf.mxu3 }
 0x189   :  { %v208_v21 = vsel %vm129_vm3, %v205_v20, -inf }
 0x18a   :  { %209 = vmax.xlane.f32.xlu1 %v208_v21 }
 0x198   :  { %154 = vrot.lane.b32.xlu0 %v1428_v5, %s1377_s29 }
 0x1ef   :  { %v132_v22 = vpop.xlane.xlu0 %131 }
 0x1f0   :  { %v133_v23 = vsub.f32 %v126_v14, %v132_v22 }
 0x1f2   :  { %v134_v24 = vmul.f32 1.442695, %v133_v23 }
 0x1f4   :  { %1299 = vpow2.f32 %v134_v24 }
 0x1f7   :  { %v292_v25 = vpop.xlane.xlu0 %291 }
 0x1f8   :  { %v370_v26 = vpop.xlane.xlu2 %369  ;;  %v293_v27 = vsub.f32 %v287_v16, %v292_v25 }
 0x1f9   :  { %v371_v28 = vsub.f32 %v365_v17, %v370_v26 }
 0x1fa   :  { %v1300_v29 = vpop.eup %1299  ;;  %v294_v30 = vmul.f32 1.442695, %v293_v27 }
 0x1fb   :  { %v372_v31 = vmul.f32 1.442695, %v371_v28  ;;  %v136_v32 = vsel %vm129_vm3, %v1300_v29, 0.0 }
 0x1fc   :  { %1301 = vpow2.f32 %v294_v30  ;;  %137 = vadd.xlane.f32.xlu2 %v136_v32 }
 0x1fd   :  { %1303 = vpow2.f32 %v372_v31  ;;  %v210_v33 = vpop.xlane.xlu1 %209 }
 0x1fe   :  { %v211_v34 = vsub.f32 %v205_v20, %v210_v33 }
 0x200   :  { %v212_v35 = vmul.f32 1.442695, %v211_v34 }
 0x202   :  { %v1459_v36 = vpop.eup %1301  ;;  %1305 = vpow2.f32 %v212_v35 }
 0x203   :  { %v1461_v37 = vpop.eup %1303  ;;  %v296_v38 = vsel %vm129_vm3, %v1459_v36, 0.0 }
 0x204   :  { %v374_v39 = vsel %vm129_vm3, %v1461_v37, 0.0  ;;  %297 = vadd.xlane.f32.xlu0 %v296_v38  ;;  %v41_v38 = vld [vmem:[#allocation2 + $0x8] sm:$0xf] }
 0x205   :  { %375 = vadd.xlane.f32.xlu2 %v374_v39  ;;  %1225 = vmatpush.msk.msra.mxu1 %vm74_vm0, %v41_v38 }
 0x208   :  { %v1467_v40 = vpop.eup %1305 }
 0x209   :  { %v214_v41 = vsel %vm129_vm3, %v1467_v40, 0.0 }
 0x20a   :  { %215 = vadd.xlane.f32.xlu1 %v214_v41  ;;  %v155_v42 = vpop.permute.xlu0 %154 }
 0x20b   :  { %175 = vmatpush.msrb.mxu2 %v155_v42  ;;  %v1288_v42 = vld [vmem:[%s1688_s3 + $0x1] ss:$0 sm:$0xff] }
 0x21d   :  { %392 = vrot.lane.b32.xlu2 %v1434_v7, %s1378_s30 }
 0x223   :  { %232 = vrot.lane.b32.xlu1 %v1428_v5, %s1378_s30 }
 0x22b   :  { %314 = vrot.lane.b32.xlu1 %v1434_v7, %s1377_s29 }
 0x26f   :  { %v138_v43 = vpop.xlane.xlu2 %137 }
 0x270   :  { %1307 = vrcp.f32 %v138_v43  ;;  %v150_v50 = vand.u32 2147483648, %v138_v43  ;;  %v148_v51 = vand.u32 2147483647, %v138_v43  ;;  %vm144_vm5 = vweird.f32 %v138_v43 }
 0x272   :  { %v151_v54 = vor.u32 1.1754944e-38, %v150_v50  ;;  %vm149_vm7 = vcmp.eq.f32.partialorder %v148_v51, 8.507059e+37 }
 0x276   :  { %v1308_v44 = vpop.eup %1307 }
 0x277   :  { %v140_v45 = vmul.f32 %v1308_v44, %v138_v43  ;;  %v1475_v47 = vpop.xlane.xlu0 %297  ;;  %vm145_vm4 = vweird.f32 %v1308_v44 }
 0x278   :  { %v376_v48 = vpop.xlane.xlu2 %375  ;;  %1309 = vrcp.f32 %v1475_v47  ;;  %vm146_vm6 = vmor %vm144_vm5, %vm145_vm4  ;;  %vm304_vm14 = vweird.f32 %v1475_v47  ;;  %v310_v17 = vand.u32 2147483648, %v1475_v47  ;;  %v308_v20 = vand.u32 2147483647, %v1475_v47 }
 0x279   :  { %v141_v46 = vsub.f32 1.0, %v140_v45  ;;  %1311 = vrcp.f32 %v376_v48  ;;  %v388_v16 = vand.u32 2147483648, %v376_v48  ;;  %vm382_vm15 = vweird.f32 %v376_v48 }
 0x27a   :  { %v386_v18 = vand.u32 2147483647, %v376_v48  ;;  %v311_v27 = vor.u32 1.1754944e-38, %v310_v17 }
 0x27b   :  { %v142_v49 = vmul.f32 %v1308_v44, %v141_v46  ;;  %v389_v26 = vor.u32 1.1754944e-38, %v388_v16 }
 0x27d   :  { %v143_v52 = vadd.f32 %v1308_v44, %v142_v49  ;;  %v216_v53 = vpop.xlane.xlu1 %215 }
 0x27e   :  { %1313 = vrcp.f32 %v216_v53  ;;  %v1310_v57 = vpop.eup %1309  ;;  %v228_v7 = vand.u32 2147483648, %v216_v53  ;;  %vm222_vm9 = vweird.f32 %v216_v53  ;;  %v226_v8 = vand.u32 2147483647, %v216_v53 }
 0x27f   :  { %v147_v55 = vsel %vm146_vm6, %v1308_v44, %v143_v52  ;;  %v1312_v59 = vpop.eup %1311  ;;  %v300_v63 = vmul.f32 %v1310_v57, %v1475_v47  ;;  %vm305_vm12 = vweird.f32 %v1310_v57  ;;  %vm387_vm6 = vcmp.eq.f32.partialorder %v386_v18, 8.507059e+37 }
 0x280   :  { %v152_v56 = vsel %vm149_vm7, %v151_v54, %v147_v55  ;;  %v378_v62 = vmul.f32 %v1312_v59, %v376_v48  ;;  %v229_v12 = vor.u32 1.1754944e-38, %v228_v7  ;;  %vm227_vm11 = vcmp.eq.f32.partialorder %v226_v8, 8.507059e+37  ;;  %vm1482_vm4 = vmor %vm304_vm14, %vm305_vm12  ;;  %v393_v24 = vpop.permute.xlu2 %392 }
 0x281   :  { %v153_v58 = vmul.f32 %v1300_v29, %v152_v56  ;;  %v301_v5 = vsub.f32 1.0, %v300_v63  ;;  %vm383_vm13 = vweird.f32 %v1312_v59  ;;  %vm309_vm7 = vcmp.eq.f32.partialorder %v308_v20, 8.507059e+37  ;;  %v1542_v20 = vld [vmem:[%s1686_s1 + $0x10] sm:$0xff] }
 0x282   :  { %v379_v4 = vsub.f32 1.0, %v378_v62  ;;  %vm384_vm5 = vmor %vm382_vm15, %vm383_vm13  ;;  %v1380_v55 = vmov 4.0  }
 0x283   :  { %1215 = vmatmul.msk.f32.vlgmr.msrb.gmra.mxu2 %vm129_vm3, %v153_v58  ;;  %v302_v10 = vmul.f32 %v1310_v57, %v301_v5  ;;  %1315 = vrcp.f32 %v1380_v55  ;;  %v1524_v5 = vld [vmem:[%s1686_s1 + $0x8] sm:$0xff] }
 0x284   :  { %v1314_v60 = vpop.eup %1313  ;;  %v380_v9 = vmul.f32 %v1312_v59, %v379_v4  ;;  %v1516_v4 = vld [vmem:[%s1686_s1] sm:$0xff] }
 0x285   :  { %v218_v61 = vmul.f32 %v1314_v60, %v216_v53  ;;  %vm223_vm8 = vweird.f32 %v1314_v60  ;;  %v303_v15 = vadd.f32 %v1310_v57, %v302_v10 }
 0x286   :  { %vm224_vm10 = vmor %vm222_vm9, %vm223_vm8  ;;  %v381_v14 = vadd.f32 %v1312_v59, %v380_v9 }
 0x287   :  { %v219_v0 = vsub.f32 1.0, %v218_v61  ;;  %v307_v25 = vsel %vm1482_vm4, %v1310_v57, %v303_v15 }
 0x288   :  { %v385_v23 = vsel %vm384_vm5, %v1312_v59, %v381_v14  ;;  %v312_v29 = vsel %vm309_vm7, %v311_v27, %v307_v25  ;;  %v1552_v25 = vld [vmem:[%s1686_s1 + $0x18] sm:$0xff]  ;;  %v1291_v27 = vld [vmem:[%s1688_s3 + $0x3] ss:$0 sm:$0xff] }
 0x289   :  { %v220_v3 = vmul.f32 %v1314_v60, %v219_v0  ;;  %v390_v28 = vsel %vm387_vm6, %v389_v26, %v385_v23  ;;  %v313_v31 = vmul.f32 %v1459_v36, %v312_v29  ;;  %v1316_v56 = vpop.eup %1315  ;;  %v1290_v23 = vld [vmem:[%s1688_s3 + $0x2] ss:$0 sm:$0xff]  ;;  %vm668_vm6 = vcmask 130048  }
 0x28a   :  { %v391_v32 = vmul.f32 %v1461_v37, %v390_v28  ;;  %vm475_vm9 = vweird.f32 %v1316_v56 }
 0x28b   :  { %v221_v6 = vadd.f32 %v1314_v60, %v220_v3  ;;  %v45_v3 = vld [vmem:[#allocation2 + $0x18] sm:$0x3f] }
 0x28d   :  { %v225_v11 = vsel %vm224_vm10, %v1314_v60, %v221_v6  ;;  %vm571_vm10 = vcmask 1045504  }
 0x28e   :  { %v230_v13 = vsel %vm227_vm11, %v229_v12, %v225_v11  ;;  %vm558_vm11 = vcmask 48128   ;;  %1231 = vmatpush.msk.msra.mxu0 %vm571_vm10, %v45_v3  ;;  %v1533_v11 = vld [vmem:[%s1688_s3 + $0x4] ss:$0 sm:$0xff]  ;;  %v43_v12 = vld [vmem:[#allocation2 + $0x10] sm:$0xf] }
 0x28f   :  { %v231_v22 = vmul.f32 %v1467_v40, %v230_v13  ;;  %1232 = vmatmul.msk.f32.vlgmr.msra.gmra.mxu0 %vm558_vm11, %v1516_v4 }
 0x295   :  { %v233_v21 = vpop.permute.xlu1 %232 }
 0x296   :  { %253 = vmatpush.msra.mxu2 %v233_v21 }
 0x297   :  { %1218 = vmatmul.msk.f32.vlgmr.msra.gmra.mxu2 %vm129_vm3, %v231_v22  ;;  %1233 = vmatmul.msk.f32.gmra.mxu0 %vm558_vm11, %v1524_v5 }
 0x298   :  { %413 = vmatpush.msrb.mxu2 %v393_v24 }
 0x29d   :  { %v315_v30 = vpop.permute.xlu1 %314 }
 0x29e   :  { %335 = vmatpush.msrb.mxu3 %v315_v30 }
 0x29f   :  { %1221 = vmatmul.msk.f32.vlgmr.msrb.gmra.mxu3 %vm129_vm3, %v313_v31  ;;  %1224 = vmatmul.msk.f32.vlgmr.msrb.gmra.mxu2 %vm129_vm3, %v391_v32 }
 0x2a0   :  { %1228 = vmatpush.msk.msra.mxu3 %vm74_vm0, %v43_v12  ;;  %1234 = vmatmul.msk.f32.gmra.mxu0 %vm558_vm11, %v1542_v20 }
 0x2a8   :  { %1235 = vmatmul.msk.f32.gmra.mxu0 %vm558_vm11, %v1552_v25 }
 0x306   :  { %v177_v33 = vpop.f32.mrf.mxu2 }
 0x31a   :  { %v255_v34 = vpop.f32.mrf.mxu2 }
 0x31b   :  { %259 = vrot.lane.b32.xlu2 %v255_v34, %s1379_s5 }
 0x322   :  { %v415_v35 = vpop.f32.mrf.mxu2  ;;  %v337_v37 = vpop.f32.mrf.mxu3 }
 0x323   :  { %419 = vrot.lane.b32.xlu1 %v415_v35, %s1379_s5 }
 0x375   :  { %v260_v39 = vpop.permute.xlu2 %259 }
 0x376   :  { %v262_v36 = vsel %vm104_vm2, %v177_v33, %v260_v39  ;;  %v592_v33 = vpop.f32.mrf.mxu0 }
 0x377   :  { %1226 = vmatmul.msk.f32.vlgmr.msra.gmra.mxu1 %vm67_vm1, %v262_v36 }
 0x37e   :  { %v595_v36 = vpop.f32.mrf.mxu0 }
 0x395   :  { %v420_v40 = vpop.permute.xlu1 %419 }
 0x396   :  { %v422_v41 = vsel %vm104_vm2, %v337_v37, %v420_v40 }
 0x397   :  { %1227 = vmatmul.msk.f32.gmra.mxu1 %vm67_vm1, %v422_v41 }
 0x3f4   :  { %v450_v43 = vpop.f32.mrf.mxu1 }
 0x3f5   :  { %v451_v44 = vadd.f32 %v1288_v42, %v450_v43 }
 0x3f7   :  { %v456_v45 = vadd.f32 %v451_v44, %v1412_v1  ;;  %v471_v1 = vmul.f32 4.0, %v1316_v56 }
 0x3f9   :  { %vm458_vm3 = vcmp.ge.f32.partialorder %v456_v45, 0.0  ;;  %v460_v46 = vmul.f32 0.2, %v456_v45  ;;  %v472_v57 = vsub.f32 1.0, %v471_v1 }
 0x3fb   :  { %v462_v47 = vsel %vm458_vm3, %v456_v45, %v460_v46  ;;  %v473_v58 = vmul.f32 %v1316_v56, %v472_v57 }
 0x3fc   :  { %v464_v48 = vsel %vm67_vm1, %v462_v47, 0.0 }
 0x3fd   :  { %465 = vadd.xlane.f32.xlu2 %v464_v48  ;;  %v474_v59 = vadd.f32 %v1316_v56, %v473_v58  ;;  %v598_v48 = vpop.f32.mrf.mxu0 }
 0x3ff   :  { %v1509_v60 = vsel %vm475_vm9, %v1316_v56, %v474_v59 }
 0x414   :  { %v453_v49 = vpop.f32.mrf.mxu1 }
 0x415   :  { %v454_v50 = vadd.f32 %v1288_v42, %v453_v49 }
 0x417   :  { %v457_v51 = vadd.f32 %v454_v50, %v1417_v2  ;;  %v601_v50 = vpop.f32.mrf.mxu0 }
 0x419   :  { %vm459_vm8 = vcmp.ge.f32.partialorder %v457_v51, 0.0  ;;  %v461_v52 = vmul.f32 0.2, %v457_v51 }
 0x41b   :  { %v463_v53 = vsel %vm459_vm8, %v457_v51, %v461_v52 }
 0x41c   :  { %v467_v54 = vsel %vm67_vm1, %v463_v53, 0.0 }
 0x41d   :  { %468 = vadd.xlane.f32.xlu1 %v467_v54 }
 0x470   :  { %v466_v61 = vpop.xlane.xlu2 %465 }
 0x471   :  { %v477_v62 = vmul.f32 %v1509_v60, %v466_v61 }
 0x473   :  { %v479_v2 = vsub.f32 %v462_v47, %v477_v62 }
 0x475   :  { %v481_v63 = vmul.f32 %v479_v2, %v479_v2 }
 0x477   :  { %v483_v0 = vsel %vm67_vm1, %v481_v63, 0.0  ;;  %v47_v63 = vld [vmem:[#allocation2 + $0x20] sm:$0x3f] }
 0x478   :  { %484 = vadd.xlane.f32.xlu0 %v483_v0  ;;  %1236 = vmatpush.msk.msra.mxu2 %vm571_vm10, %v47_v63 }
 0x479   :  { %1237 = vmatmul.msk.f32.vlgmr.msra.gmra.mxu2 %vm558_vm11, %v1516_v4 }
 0x481   :  { %1238 = vmatmul.msk.f32.gmra.mxu2 %vm558_vm11, %v1524_v5 }
 0x489   :  { %1239 = vmatmul.msk.f32.gmra.mxu2 %vm558_vm11, %v1542_v20 }
 0x490   :  { %v469_v6 = vpop.xlane.xlu1 %468 }
 0x491   :  { %v478_v7 = vmul.f32 %v1509_v60, %v469_v6  ;;  %1240 = vmatmul.msk.f32.gmra.mxu2 %vm558_vm11, %v1552_v25 }
 0x493   :  { %v480_v8 = vsub.f32 %v463_v53, %v478_v7 }
 0x495   :  { %v482_v9 = vmul.f32 %v480_v8, %v480_v8 }
 0x497   :  { %v486_v10 = vsel %vm67_vm1, %v482_v9, 0.0 }
 0x498   :  { %487 = vadd.xlane.f32.xlu0 %v486_v10 }
 0x4ac   :  { %555 = vrot.lane.b32.xlu0 %v1533_v11, %s1375_s0 }
 0x4eb   :  { %v485_v13 = vpop.xlane.xlu0 %484 }
 0x4ec   :  { %v489_v14 = vmul.f32 %v485_v13, %v1509_v60 }
 0x4ee   :  { %v491_v15 = vadd.f32 1e-05, %v489_v14 }
 0x4f0   :  { %1317 = vrsqrt.f32 %v491_v15  ;;  %vm499_vm13 = vweird.f32 %v491_v15 }
 0x4f6   :  { %v1318_v16 = vpop.eup %1317 }
 0x4f7   :  { %v494_v17 = vmul.f32 %v1318_v16, %v491_v15  ;;  %vm500_vm12 = vweird.f32 %v1318_v16 }
 0x4f8   :  { %vm501_vm14 = vmor %vm499_vm13, %vm500_vm12 }
 0x4f9   :  { %v495_v18 = vmul.f32 %v1318_v16, %v494_v17 }
 0x4fb   :  { %v496_v19 = vmul.f32 0.5, %v495_v18 }
 0x4fc   :  { %v627_v13 = vpop.f32.mrf.mxu2 }
 0x4fd   :  { %v497_v21 = vsub.f32 1.5, %v496_v19 }
 0x4ff   :  { %v498_v22 = vmul.f32 %v1318_v16, %v497_v21 }
 0x501   :  { %v502_v24 = vsel %vm501_vm14, %v1318_v16, %v498_v22 }
 0x502   :  { %v513_v26 = vmul.f32 %v502_v24, %v479_v2 }
 0x504   :  { %v516_v28 = vmul.f32 %v1290_v23, %v513_v26  ;;  %v630_v14 = vpop.f32.mrf.mxu2 }
 0x506   :  { %v1559_v29 = vadd.f32 %v1291_v27, %v516_v28 }
 0x508   :  { %1229 = vmatmul.msk.f32.vlgmr.msra.gmra.mxu3 %vm67_vm1, %v1559_v29 }
 0x50b   :  { %v488_v30 = vpop.xlane.xlu0 %487 }
 0x50c   :  { %v490_v31 = vmul.f32 %v488_v30, %v1509_v60 }
 0x50e   :  { %v492_v32 = vadd.f32 1e-05, %v490_v31 }
 0x510   :  { %1319 = vrsqrt.f32 %v492_v32  ;;  %vm509_vm4 = vweird.f32 %v492_v32 }
 0x516   :  { %v1320_v34 = vpop.eup %1319 }
 0x517   :  { %v504_v35 = vmul.f32 %v1320_v34, %v492_v32  ;;  %vm510_vm15 = vweird.f32 %v1320_v34 }
 0x518   :  { %vm511_vm5 = vmor %vm509_vm4, %vm510_vm15 }
 0x519   :  { %v505_v38 = vmul.f32 %v1320_v34, %v504_v35 }
 0x51b   :  { %v506_v39 = vmul.f32 0.5, %v505_v38 }
 0x51d   :  { %v507_v37 = vsub.f32 1.5, %v506_v39 }
 0x51e   :  { %v556_v40 = vpop.permute.xlu0 %555 }
 0x51f   :  { %v508_v41 = vmul.f32 %v1320_v34, %v507_v37  ;;  %v593_v42 = vadd.f32 %v592_v33, %v556_v40  ;;  %v596_v43 = vadd.f32 %v595_v36, %v556_v40  ;;  %v602_v51 = vadd.f32 %v601_v50, %v556_v40 }
 0x520   :  { %v599_v54 = vadd.f32 %v598_v48, %v556_v40 }
 0x521   :  { %v512_v44 = vsel %vm511_vm5, %v1320_v34, %v508_v41  ;;  %718 = vrot.lane.b32.xlu1 %v593_v42, %s1374_s27  ;;  %720 = vrot.lane.b32.xlu2 %v596_v43, %s1374_s27 }
 0x522   :  { %v514_v45 = vmul.f32 %v512_v44, %v480_v8  ;;  %1241 = vmatpush.xpose.msk.msrb.mxu1 %vm104_vm2, %v596_v43 }
 0x524   :  { %v517_v46 = vmul.f32 %v1290_v23, %v514_v45 }
 0x526   :  { %v1567_v47 = vadd.f32 %v1291_v27, %v517_v46  ;;  %1242 = vmatpush.xpose.msk.msrb.mxu1 %vm104_vm2, %v593_v42  ;;  %v633_v46 = vpop.f32.mrf.mxu2 }
 0x528   :  { %1230 = vmatmul.msk.f32.gmra.mxu3 %vm67_vm1, %v1567_v47 }
 0x529   :  { %888 = vrot.lane.b32.xlu2 %v602_v51, %s1374_s27 }
 0x57b   :  { %v721_v49 = vpop.permute.xlu2 %720 }
 0x57c   :  { %1245 = vmatpush.xpose.msk.msra.mxu1 %vm104_vm2, %v721_v49  ;;  %v636_v49 = vpop.f32.mrf.mxu2 }
 0x583   :  { %v889_v57 = vpop.permute.xlu2 %888 }
 0x584   :  { %1253 = vmatpush.xpose.msk.msrb.mxu0 %vm104_vm2, %v889_v57 }
 0x58b   :  { %v548_v52 = vpop.f32.mrf.mxu3 }
 0x58c   :  { %v549_v53 = vadd.f32 %v1533_v11, %v548_v52 }
 0x58e   :  { %716 = vrot.lane.b32.xlu0 %v549_v53, %s1374_s27  ;;  %1243 = vmatmul.msk.f32.vlgmr.msrb.gmra.mxu1 %vm104_vm2, %v549_v53 }
 0x593   :  { %v719_v55 = vpop.permute.xlu1 %718 }
 0x594   :  { %1246 = vmatpush.xpose.msk.msra.mxu1 %vm104_vm2, %v719_v55 }
 0x596   :  { %886 = vrot.lane.b32.xlu0 %v599_v54, %s1374_s27 }
 0x598   :  { %1249 = vmatpush.xpose.msk.msrb.mxu1 %vm104_vm2, %v602_v51 }
 0x59c   :  { %1250 = vmatpush.xpose.msk.msrb.mxu1 %vm104_vm2, %v599_v54 }
 0x5ab   :  { %v551_v56 = vpop.f32.mrf.mxu3 }
 0x5ac   :  { %v552_v1 = vadd.f32 %v1533_v11, %v551_v56 }
 0x5ae   :  { %884 = vrot.lane.b32.xlu1 %v552_v1, %s1374_s27 }
 0x600   :  { %v717_v58 = vpop.permute.xlu0 %716 }
 0x601   :  { %1247 = vmatmul.msk.f32.vlgmr.msra.gmra.mxu1 %vm104_vm2, %v717_v58 }
 0x608   :  { %v887_v59 = vpop.permute.xlu0 %886 }
 0x609   :  { %1251 = vmatmul.msk.f32.vlgmr.msrb.gmra.mxu1 %vm104_vm2, %v552_v1  ;;  %1254 = vmatpush.xpose.msk.msrb.mxu0 %vm104_vm2, %v887_v59 }
 0x60b   :  { %v665_v61 = vpop.f32.mrf.mxu1 }
 0x60c   :  { %v669_v62 = vsel %vm668_vm6, %v665_v61, -inf }
 0x60d   :  { %670 = vmax.xlane.f32.xlu2 %v669_v62 }
 0x620   :  { %v885_v2 = vpop.permute.xlu1 %884 }
 0x621   :  { %1255 = vmatmul.msk.f32.vlgmr.msrb.gmra.mxu0 %vm104_vm2, %v885_v2 }
 0x625   :  { %604 = vrot.lane.b32.xlu2 %v1533_v11, %s1377_s29 }
 0x67e   :  { %v745_v0 = vpop.f32.mrf.mxu1 }
 0x67f   :  { %v748_v3 = vsel %vm668_vm6, %v745_v0, -inf }
 0x680   :  { %v671_v6 = vpop.xlane.xlu2 %670  ;;  %749 = vmax.xlane.f32.xlu0 %v748_v3 }
 0x681   :  { %v672_v7 = vsub.f32 %v665_v61, %v671_v6 }
 0x683   :  { %v673_v8 = vmul.f32 1.442695, %v672_v7 }
 0x685   :  { %1321 = vpow2.f32 %v673_v8 }
 0x686   :  { %v834_v11 = vpop.f32.mrf.mxu1 }
 0x687   :  { %v837_v12 = vsel %vm668_vm6, %v834_v11, -inf }
 0x688   :  { %v605_v15 = vpop.permute.xlu2 %604 }
 0x689   :  { %v631_v16 = vadd.f32 %v630_v14, %v605_v15  ;;  %v628_v17 = vadd.f32 %v627_v13, %v605_v15  ;;  %v634_v50 = vadd.f32 %v633_v46, %v605_v15  ;;  %v637_v51 = vadd.f32 %v636_v49, %v605_v15 }
 0x68b   :  { %v1322_v9 = vpop.eup %1321  ;;  %710 = vmatpush.msrb.mxu3 %v631_v16  ;;  %v1277_v34 = vpack.i.bf16 %v628_v17, %v631_v16  ;;  %v1282_v52 = vpack.i.bf16 %v634_v50, %v637_v51 }
 0x68c   :  { %v675_v4 = vsel %vm668_vm6, %v1322_v9, 0.0 }
 0x68d   :  { %676 = vadd.xlane.f32.xlu0 %v675_v4  ;;  %711 = vmatpush.msrb.mxu3 %v628_v17 }
 0x69e   :  { %v913_v10 = vpop.f32.mrf.mxu0 }
 0x69f   :  { %v916_v5 = vsel %vm668_vm6, %v913_v10, -inf }
 0x6a0   :  { %917 = vmax.xlane.f32.xlu1 %v916_v5 }
 0x6a8   :  { %838 = vmax.xlane.f32.xlu1 %v837_v12 }
 0x6f3   :  { %v750_v18 = vpop.xlane.xlu0 %749 }
 0x6f4   :  { %v751_v19 = vsub.f32 %v745_v0, %v750_v18 }
 0x6f6   :  { %v752_v20 = vmul.f32 1.442695, %v751_v19 }
 0x6f8   :  { %1323 = vpow2.f32 %v752_v20 }
 0x6fe   :  { %v1604_v21 = vpop.eup %1323 }
 0x6ff   :  { %v754_v22 = vsel %vm668_vm6, %v1604_v21, 0.0 }
 0x700   :  { %755 = vadd.xlane.f32.xlu0 %v754_v22  ;;  %v677_v23 = vpop.xlane.xlu0 %676 }
 0x701   :  { %1325 = vrcp.f32 %v677_v23  ;;  %v689_v27 = vand.u32 2147483648, %v677_v23  ;;  %v687_v30 = vand.u32 2147483647, %v677_v23  ;;  %vm683_vm3 = vweird.f32 %v677_v23 }
 0x703   :  { %v690_v32 = vor.u32 1.1754944e-38, %v689_v27  ;;  %vm688_vm9 = vcmp.eq.f32.partialorder %v687_v30, 8.507059e+37 }
 0x707   :  { %v1326_v24 = vpop.eup %1325 }
 0x708   :  { %v679_v25 = vmul.f32 %v1326_v24, %v677_v23  ;;  %vm684_vm7 = vweird.f32 %v1326_v24 }
 0x709   :  { %vm685_vm8 = vmor %vm683_vm3, %vm684_vm7 }
 0x70a   :  { %v680_v26 = vsub.f32 1.0, %v679_v25 }
 0x70c   :  { %v681_v28 = vmul.f32 %v1326_v24, %v680_v26 }
 0x70e   :  { %v682_v31 = vadd.f32 %v1326_v24, %v681_v28 }
 0x710   :  { %v686_v33 = vsel %vm685_vm8, %v1326_v24, %v682_v31 }
 0x711   :  { %v691_v35 = vsel %vm688_vm9, %v690_v32, %v686_v33 }
 0x712   :  { %v692_v38 = vmul.f32 %v1322_v9, %v691_v35 }
 0x713   :  { %v918_v39 = vpop.xlane.xlu1 %917 }
 0x714   :  { %v919_v36 = vsub.f32 %v913_v10, %v918_v39  ;;  %1278 = vrot.lane.b32.xlu0 %v1277_v34, %s1374_s27  ;;  %1244 = vmatmul.msk.f32.vlgmr.msrb.gmra.mxu3 %vm668_vm6, %v692_v38  ;;  %v49_v38 = vld [vmem:[#allocation2 + $0x28] sm:$0xf] }
 0x715   :  { %1257 = vmatpush.msk.msra.mxu1 %vm74_vm0, %v49_v38 }
 0x716   :  { %v920_v37 = vmul.f32 1.442695, %v919_v36 }
 0x718   :  { %1327 = vpow2.f32 %v920_v37 }
 0x71b   :  { %v839_v40 = vpop.xlane.xlu1 %838 }
 0x71c   :  { %v840_v41 = vsub.f32 %v834_v11, %v839_v40 }
 0x71e   :  { %v1610_v42 = vpop.eup %1327  ;;  %v841_v43 = vmul.f32 1.442695, %v840_v41 }
 0x71f   :  { %v922_v44 = vsel %vm668_vm6, %v1610_v42, 0.0 }
 0x720   :  { %1329 = vpow2.f32 %v841_v43  ;;  %923 = vadd.xlane.f32.xlu1 %v922_v44 }
 0x726   :  { %v1614_v45 = vpop.eup %1329 }
 0x727   :  { %v843_v48 = vsel %vm668_vm6, %v1614_v45, 0.0 }
 0x728   :  { %844 = vadd.xlane.f32.xlu2 %v843_v48 }
 0x739   :  { %1283 = vrot.lane.b32.xlu1 %v1282_v52, %s1374_s27 }
 0x773   :  { %v756_v53 = vpop.xlane.xlu0 %755 }
 0x774   :  { %1331 = vrcp.f32 %v756_v53  ;;  %v768_v58 = vand.u32 2147483648, %v756_v53  ;;  %vm762_vm11 = vweird.f32 %v756_v53  ;;  %v766_v59 = vand.u32 2147483647, %v756_v53 }
 0x776   :  { %v769_v62 = vor.u32 1.1754944e-38, %v768_v58  ;;  %vm767_vm13 = vcmp.eq.f32.partialorder %v766_v59, 8.507059e+37 }
 0x77a   :  { %v1332_v54 = vpop.eup %1331 }
 0x77b   :  { %v758_v55 = vmul.f32 %v1332_v54, %v756_v53  ;;  %vm763_vm10 = vweird.f32 %v1332_v54 }
 0x77c   :  { %vm764_vm12 = vmor %vm762_vm11, %vm763_vm10 }
 0x77d   :  { %v759_v56 = vsub.f32 1.0, %v758_v55 }
 0x77f   :  { %v760_v1 = vmul.f32 %v1332_v54, %v759_v56 }
 0x781   :  { %v761_v57 = vadd.f32 %v1332_v54, %v760_v1 }
 0x783   :  { %v765_v61 = vsel %vm764_vm12, %v1332_v54, %v761_v57 }
 0x784   :  { %v770_v63 = vsel %vm767_vm13, %v769_v62, %v765_v61 }
 0x785   :  { %v771_v6 = vmul.f32 %v1604_v21, %v770_v63  ;;  %v51_v63 = vld [vmem:[#allocation2 + $0x30] sm:$0xf] }
 0x786   :  { %v1279_v2 = vpop.permute.xlu0 %1278 }
 0x787   :  { %v1281_v0 = vunpack.i.h.bf16 %v1279_v2  ;;  %v1280_v3 = vunpack.i.l.bf16 %v1279_v2 }
 0x789   :  { %797 = vmatpush.msra.mxu3 %v1280_v3 }
 0x78b   :  { %798 = vmatpush.msra.mxu3 %v1281_v0 }
 0x78c   :  { %1248 = vmatmul.msk.f32.vlgmr.msra.gmra.mxu3 %vm668_vm6, %v771_v6 }
 0x78d   :  { %878 = vmatpush.msrb.mxu3 %v637_v51 }
 0x78f   :  { %879 = vmatpush.msrb.mxu3 %v634_v50 }
 0x791   :  { %1260 = vmatpush.msk.msra.mxu3 %vm74_vm0, %v51_v63 }
 0x793   :  { %v924_v7 = vpop.xlane.xlu1 %923 }
 0x794   :  { %1333 = vrcp.f32 %v924_v7  ;;  %vm930_vm15 = vweird.f32 %v924_v7  ;;  %v936_v15 = vand.u32 2147483648, %v924_v7  ;;  %v934_v17 = vand.u32 2147483647, %v924_v7 }
 0x796   :  { %v937_v22 = vor.u32 1.1754944e-38, %v936_v15  ;;  %vm935_vm8 = vcmp.eq.f32.partialorder %v934_v17, 8.507059e+37 }
 0x797   :  { %v713_v33 = vpop.f32.mrf.mxu3 }
 0x79a   :  { %v1334_v8 = vpop.eup %1333 }
 0x79b   :  { %v926_v9 = vmul.f32 %v1334_v8, %v924_v7  ;;  %v845_v4 = vpop.xlane.xlu2 %844  ;;  %vm931_vm14 = vweird.f32 %v1334_v8 }
 0x79c   :  { %1335 = vrcp.f32 %v845_v4  ;;  %v857_v16 = vand.u32 2147483648, %v845_v4  ;;  %v855_v19 = vand.u32 2147483647, %v845_v4  ;;  %vm932_vm5 = vmor %vm930_vm15, %vm931_vm14  ;;  %vm851_vm7 = vweird.f32 %v845_v4 }
 0x79d   :  { %v927_v10 = vsub.f32 1.0, %v926_v9 }
 0x79e   :  { %v858_v23 = vor.u32 1.1754944e-38, %v857_v16  ;;  %vm856_vm9 = vcmp.eq.f32.partialorder %v855_v19, 8.507059e+37 }
 0x79f   :  { %v928_v5 = vmul.f32 %v1334_v8, %v927_v10 }
 0x7a1   :  { %v929_v13 = vadd.f32 %v1334_v8, %v928_v5 }
 0x7a2   :  { %v1336_v11 = vpop.eup %1335 }
 0x7a3   :  { %v847_v12 = vmul.f32 %v1336_v11, %v845_v4  ;;  %vm852_vm4 = vweird.f32 %v1336_v11  ;;  %v933_v20 = vsel %vm932_vm5, %v1334_v8, %v929_v13 }
 0x7a4   :  { %vm853_vm3 = vmor %vm851_vm7, %vm852_vm4  ;;  %v938_v26 = vsel %vm935_vm8, %v937_v22, %v933_v20 }
 0x7a5   :  { %v848_v14 = vsub.f32 1.0, %v847_v12  ;;  %v939_v32 = vmul.f32 %v1610_v42, %v938_v26  ;;  %v1292_v42 = vld [vmem:[%s1688_s3 + $0x5] ss:$0 sm:$0xff] }
 0x7a7   :  { %v849_v18 = vmul.f32 %v1336_v11, %v848_v14  ;;  %v1294_v14 = vld [vmem:[%s1688_s3 + $0x7] ss:$0 sm:$0xff] }
 0x7a9   :  { %v850_v21 = vadd.f32 %v1336_v11, %v849_v18 }
 0x7ab   :  { %v854_v24 = vsel %vm853_vm3, %v1336_v11, %v850_v21  ;;  %v1284_v25 = vpop.permute.xlu1 %1283  ;;  %v1293_v11 = vld [vmem:[%s1688_s3 + $0x6] ss:$0 sm:$0xff] }
 0x7ac   :  { %v859_v27 = vsel %vm856_vm9, %v858_v23, %v854_v24  ;;  %v1285_v28 = vunpack.i.l.bf16 %v1284_v25  ;;  %v1286_v31 = vunpack.i.h.bf16 %v1284_v25 }
 0x7ad   :  { %v860_v30 = vmul.f32 %v1614_v45, %v859_v27 }
 0x7ae   :  { %965 = vmatpush.msrb.mxu2 %v1285_v28 }
 0x7af   :  { %1252 = vmatmul.msk.f32.vlgmr.msrb.gmra.mxu3 %vm668_vm6, %v860_v30 }
 0x7b0   :  { %966 = vmatpush.msrb.mxu2 %v1286_v31  ;;  %v53_v31 = vld [vmem:[#allocation2 + $0x38] sm:$0xf] }
 0x7b1   :  { %1256 = vmatmul.msk.f32.vlgmr.msrb.gmra.mxu2 %vm668_vm6, %v939_v32  ;;  %1263 = vmatpush.msk.msra.mxu0 %vm74_vm0, %v53_v31  ;;  %v1295_v32 = vld [vmem:[%s1688_s3 + $0x8] ss:$0 sm:$0xff] }
 0x80f   :  { %v800_v34 = vpop.f32.mrf.mxu3 }
 0x810   :  { %804 = vrot.lane.b32.xlu0 %v800_v34, %s1379_s5 }
 0x832   :  { %v881_v37 = vpop.f32.mrf.mxu3 }
 0x834   :  { %v968_v35 = vpop.f32.mrf.mxu2 }
 0x835   :  { %972 = vrot.lane.b32.xlu1 %v968_v35, %s1379_s5 }
 0x882   :  { %v805_v39 = vpop.permute.xlu0 %804 }
 0x883   :  { %v807_v36 = vsel %vm104_vm2, %v713_v33, %v805_v39 }
 0x884   :  { %1258 = vmatmul.msk.f32.vlgmr.msra.gmra.mxu1 %vm67_vm1, %v807_v36 }
 0x8a7   :  { %v973_v40 = vpop.permute.xlu1 %972 }
 0x8a8   :  { %v975_v41 = vsel %vm104_vm2, %v881_v37, %v973_v40 }
 0x8a9   :  { %1259 = vmatmul.msk.f32.gmra.mxu1 %vm67_vm1, %v975_v41  ;;  %v1296_v41 = vld [vmem:[%s1688_s3 + $0x9] ss:$0 sm:$0xff] }
 0x901   :  { %v1003_v43 = vpop.f32.mrf.mxu1 }
 0x902   :  { %v1004_v44 = vadd.f32 %v1292_v42, %v1003_v43 }
 0x904   :  { %v1009_v45 = vadd.f32 %v1004_v44, %v1559_v29 }
 0x906   :  { %vm1011_vm6 = vcmp.ge.f32.partialorder %v1009_v45, 0.0  ;;  %v1013_v46 = vmul.f32 0.2, %v1009_v45 }
 0x908   :  { %v1015_v48 = vsel %vm1011_vm6, %v1009_v45, %v1013_v46 }
 0x909   :  { %v1017_v49 = vsel %vm67_vm1, %v1015_v48, 0.0 }
 0x90a   :  { %1018 = vadd.xlane.f32.xlu0 %v1017_v49 }
 0x926   :  { %v1006_v50 = vpop.f32.mrf.mxu1 }
 0x927   :  { %v1007_v51 = vadd.f32 %v1292_v42, %v1006_v50 }
 0x929   :  { %v1010_v52 = vadd.f32 %v1007_v51, %v1567_v47 }
 0x92b   :  { %vm1012_vm2 = vcmp.ge.f32.partialorder %v1010_v52, 0.0  ;;  %v1014_v53 = vmul.f32 0.2, %v1010_v52 }
 0x92d   :  { %v1016_v54 = vsel %vm1012_vm2, %v1010_v52, %v1014_v53 }
 0x92e   :  { %v1020_v55 = vsel %vm67_vm1, %v1016_v54, 0.0 }
 0x92f   :  { %1021 = vadd.xlane.f32.xlu1 %v1020_v55 }
 0x97d   :  { %v1019_v56 = vpop.xlane.xlu0 %1018 }
 0x97e   :  { %v1023_v1 = vmul.f32 %v1019_v56, %v1509_v60 }
 0x980   :  { %v1025_v29 = vsub.f32 %v1015_v48, %v1023_v1 }
 0x982   :  { %v1027_v57 = vmul.f32 %v1025_v29, %v1025_v29 }
 0x984   :  { %v1029_v58 = vsel %vm67_vm1, %v1027_v57, 0.0 }
 0x985   :  { %1030 = vadd.xlane.f32.xlu2 %v1029_v58 }
 0x9a2   :  { %v1022_v59 = vpop.xlane.xlu1 %1021 }
 0x9a3   :  { %v1024_v61 = vmul.f32 %v1022_v59, %v1509_v60 }
 0x9a5   :  { %v1026_v62 = vsub.f32 %v1016_v54, %v1024_v61 }
 0x9a7   :  { %v1028_v2 = vmul.f32 %v1026_v62, %v1026_v62 }
 0x9a9   :  { %v1032_v47 = vsel %vm67_vm1, %v1028_v2, 0.0 }
 0x9aa   :  { %1033 = vadd.xlane.f32.xlu2 %v1032_v47 }
 0x9f8   :  { %v1031_v0 = vpop.xlane.xlu2 %1030 }
 0x9f9   :  { %v1035_v3 = vmul.f32 %v1031_v0, %v1509_v60 }
 0x9fb   :  { %v1037_v6 = vadd.f32 1e-05, %v1035_v3 }
 0x9fd   :  { %1337 = vrsqrt.f32 %v1037_v6  ;;  %vm1045_vm11 = vweird.f32 %v1037_v6 }
 0xa03   :  { %v1338_v7 = vpop.eup %1337 }
 0xa04   :  { %v1040_v8 = vmul.f32 %v1338_v7, %v1037_v6  ;;  %vm1046_vm10 = vweird.f32 %v1338_v7 }
 0xa05   :  { %vm1047_vm12 = vmor %vm1045_vm11, %vm1046_vm10 }
 0xa06   :  { %v1041_v9 = vmul.f32 %v1338_v7, %v1040_v8 }
 0xa08   :  { %v1042_v4 = vmul.f32 0.5, %v1041_v9 }
 0xa0a   :  { %v1043_v10 = vsub.f32 1.5, %v1042_v4 }
 0xa0c   :  { %v1044_v5 = vmul.f32 %v1338_v7, %v1043_v10 }
 0xa0e   :  { %v1048_v12 = vsel %vm1047_vm12, %v1338_v7, %v1044_v5 }
 0xa0f   :  { %v1059_v13 = vmul.f32 %v1048_v12, %v1025_v29 }
 0xa11   :  { %v1062_v15 = vmul.f32 %v1293_v11, %v1059_v13  ;;  %v1297_v13 = vld [vmem:[%s1688_s3 + $0xa] ss:$0 sm:$0xff] }
 0xa13   :  { %v1065_v16 = vadd.f32 %v1294_v14, %v1062_v15  ;;  %v1298_v15 = vld [vmem:[%s1688_s3 + $0xb] ss:$0 sm:$0xff] }
 0xa15   :  { %1261 = vmatmul.msk.f32.vlgmr.msra.gmra.mxu3 %vm67_vm1, %v1065_v16 }
 0xa1d   :  { %v1034_v17 = vpop.xlane.xlu2 %1033 }
 0xa1e   :  { %v1036_v18 = vmul.f32 %v1034_v17, %v1509_v60 }
 0xa20   :  { %v1038_v19 = vadd.f32 1e-05, %v1036_v18 }
 0xa22   :  { %1339 = vrsqrt.f32 %v1038_v19  ;;  %vm1055_vm14 = vweird.f32 %v1038_v19 }
 0xa28   :  { %v1340_v20 = vpop.eup %1339 }
 0xa29   :  { %v1050_v21 = vmul.f32 %v1340_v20, %v1038_v19  ;;  %vm1056_vm13 = vweird.f32 %v1340_v20 }
 0xa2a   :  { %vm1057_vm15 = vmor %vm1055_vm14, %vm1056_vm13 }
 0xa2b   :  { %v1051_v22 = vmul.f32 %v1340_v20, %v1050_v21 }
 0xa2d   :  { %v1052_v23 = vmul.f32 0.5, %v1051_v22 }
 0xa2f   :  { %v1053_v24 = vsub.f32 1.5, %v1052_v23 }
 0xa31   :  { %v1054_v25 = vmul.f32 %v1340_v20, %v1053_v24 }
 0xa33   :  { %v1058_v26 = vsel %vm1057_vm15, %v1340_v20, %v1054_v25 }
 0xa34   :  { %v1060_v27 = vmul.f32 %v1058_v26, %v1026_v62 }
 0xa36   :  { %v1063_v28 = vmul.f32 %v1293_v11, %v1060_v27 }
 0xa38   :  { %v1066_v30 = vadd.f32 %v1294_v14, %v1063_v28 }
 0xa3a   :  { %1262 = vmatmul.msk.f32.gmra.mxu3 %vm67_vm1, %v1066_v30 }
 0xa98   :  { %v1094_v33 = vpop.f32.mrf.mxu3 }
 0xa99   :  { %v1095_v34 = vadd.f32 %v1295_v32, %v1094_v33 }
 0xa9b   :  { %vm1100_vm4 = vcmp.ge.f32.partialorder %v1095_v34, 0.0  ;;  %v1102_v35 = vmul.f32 0.2, %v1095_v34 }
 0xa9d   :  { %v1104_v38 = vsel %vm1100_vm4, %v1095_v34, %v1102_v35 }
 0xa9e   :  { %1264 = vmatmul.msk.f32.vlgmr.msra.gmra.mxu0 %vm67_vm1, %v1104_v38 }
 0xabd   :  { %v1097_v39 = vpop.f32.mrf.mxu3 }
 0xabe   :  { %v1098_v36 = vadd.f32 %v1295_v32, %v1097_v39 }
 0xac0   :  { %v1103_v37 = vmul.f32 0.2, %v1098_v36  ;;  %vm1101_vm5 = vcmp.ge.f32.partialorder %v1098_v36, 0.0 }
 0xac2   :  { %v1105_v40 = vsel %vm1101_vm5, %v1098_v36, %v1103_v37 }
 0xac3   :  { %1265 = vmatmul.msk.f32.gmra.mxu0 %vm67_vm1, %v1105_v40 }
 0xb1b   :  { %v1133_v42 = vpop.f32.mrf.mxu0 }
 0xb1c   :  { %v1134_v43 = vadd.f32 %v1296_v41, %v1133_v42 }
 0xb1e   :  { %vm1139_vm0 = vcmp.ge.f32.partialorder %v1134_v43, 0.0  ;;  %v1141_v44 = vmul.f32 0.2, %v1134_v43 }
 0xb20   :  { %v1143_v45 = vsel %vm1139_vm0, %v1134_v43, %v1141_v44 }
 0xb21   :  { %v1145_v46 = vadd.f32 %v1143_v45, %v1065_v16 }
 0xb23   :  { %vm1147_vm7 = vcmp.ge.f32.partialorder %v1145_v46, 0.0  ;;  %v1149_v48 = vmul.f32 0.2, %v1145_v46 }
 0xb25   :  { %v1151_v49 = vsel %vm1147_vm7, %v1145_v46, %v1149_v48 }
 0xb26   :  { %v1153_v50 = vsel %vm67_vm1, %v1151_v49, 0.0 }
 0xb27   :  { %1154 = vadd.xlane.f32.xlu2 %v1153_v50 }
 0xb40   :  { %v1136_v51 = vpop.f32.mrf.mxu0 }
 0xb41   :  { %v1137_v52 = vadd.f32 %v1296_v41, %v1136_v51 }
 0xb43   :  { %vm1140_vm3 = vcmp.ge.f32.partialorder %v1137_v52, 0.0  ;;  %v1142_v53 = vmul.f32 0.2, %v1137_v52 }
 0xb45   :  { %v1144_v54 = vsel %vm1140_vm3, %v1137_v52, %v1142_v53 }
 0xb46   :  { %v1146_v55 = vadd.f32 %v1144_v54, %v1066_v30 }
 0xb48   :  { %vm1148_vm8 = vcmp.ge.f32.partialorder %v1146_v55, 0.0  ;;  %v1150_v56 = vmul.f32 0.2, %v1146_v55 }
 0xb4a   :  { %v1152_v1 = vsel %vm1148_vm8, %v1146_v55, %v1150_v56 }
 0xb4b   :  { %v1156_v29 = vsel %vm67_vm1, %v1152_v1, 0.0 }
 0xb4c   :  { %1157 = vadd.xlane.f32.xlu0 %v1156_v29 }
 0xb9a   :  { %v1155_v57 = vpop.xlane.xlu2 %1154 }
 0xb9b   :  { %v1159_v58 = vmul.f32 %v1155_v57, %v1509_v60 }
 0xb9d   :  { %v1161_v59 = vsub.f32 %v1151_v49, %v1159_v58 }
 0xb9f   :  { %v1163_v61 = vmul.f32 %v1161_v59, %v1161_v59 }
 0xba1   :  { %v1165_v62 = vsel %vm67_vm1, %v1163_v61, 0.0 }
 0xba2   :  { %1166 = vadd.xlane.f32.xlu2 %v1165_v62 }
 0xbbf   :  { %v1158_v2 = vpop.xlane.xlu0 %1157 }
 0xbc0   :  { %v1160_v47 = vmul.f32 %v1158_v2, %v1509_v60 }
 0xbc2   :  { %v1162_v63 = vsub.f32 %v1152_v1, %v1160_v47 }
 0xbc4   :  { %v1164_v0 = vmul.f32 %v1162_v63, %v1162_v63 }
 0xbc6   :  { %v1168_v3 = vsel %vm67_vm1, %v1164_v0, 0.0 }
 0xbc7   :  { %1169 = vadd.xlane.f32.xlu1 %v1168_v3 }
 0xc15   :  { %v1167_v6 = vpop.xlane.xlu2 %1166 }
 0xc16   :  { %v1171_v7 = vmul.f32 %v1167_v6, %v1509_v60 }
 0xc18   :  { %v1173_v8 = vadd.f32 1e-05, %v1171_v7 }
 0xc1a   :  { %1341 = vrsqrt.f32 %v1173_v8  ;;  %vm1181_vm6 = vweird.f32 %v1173_v8 }
 0xc20   :  { %v1342_v9 = vpop.eup %1341 }
 0xc21   :  { %v1176_v4 = vmul.f32 %v1342_v9, %v1173_v8  ;;  %vm1182_vm9 = vweird.f32 %v1342_v9 }
 0xc22   :  { %vm1183_vm2 = vmor %vm1181_vm6, %vm1182_vm9 }
 0xc23   :  { %v1177_v10 = vmul.f32 %v1342_v9, %v1176_v4 }
 0xc25   :  { %v1178_v5 = vmul.f32 0.5, %v1177_v10 }
 0xc27   :  { %v1179_v11 = vsub.f32 1.5, %v1178_v5 }
 0xc29   :  { %v1180_v12 = vmul.f32 %v1342_v9, %v1179_v11 }
 0xc2b   :  { %v1184_v14 = vsel %vm1183_vm2, %v1342_v9, %v1180_v12 }
 0xc2c   :  { %v1195_v16 = vmul.f32 %v1184_v14, %v1161_v59 }
 0xc2e   :  { %v1198_v17 = vmul.f32 %v1297_v13, %v1195_v16 }
 0xc30   :  { %v1201_v18 = vadd.f32 %v1298_v15, %v1198_v17 }
 0xc32   :  { %1203 = vst.msk [vmem:[%s1689_s4] sm:$0xff] %vm67_vm1, %v1201_v18 }
 0xc3a   :  { %v1170_v19 = vpop.xlane.xlu1 %1169 }
 0xc3b   :  { %v1172_v20 = vmul.f32 %v1170_v19, %v1509_v60 }
 0xc3d   :  { %v1174_v21 = vadd.f32 1e-05, %v1172_v20 }
 0xc3f   :  { %1343 = vrsqrt.f32 %v1174_v21  ;;  %vm1191_vm11 = vweird.f32 %v1174_v21 }
 0xc45   :  { %v1344_v22 = vpop.eup %1343 }
 0xc46   :  { %v1186_v23 = vmul.f32 %v1344_v22, %v1174_v21  ;;  %vm1192_vm10 = vweird.f32 %v1344_v22 }
 0xc47   :  { %vm1193_vm12 = vmor %vm1191_vm11, %vm1192_vm10 }
 0xc48   :  { %v1187_v24 = vmul.f32 %v1344_v22, %v1186_v23 }
 0xc4a   :  { %v1188_v25 = vmul.f32 0.5, %v1187_v24 }
 0xc4c   :  { %v1189_v26 = vsub.f32 1.5, %v1188_v25 }
 0xc4e   :  { %v1190_v27 = vmul.f32 %v1344_v22, %v1189_v26 }
 0xc50   :  { %v1194_v28 = vsel %vm1193_vm12, %v1344_v22, %v1190_v27 }
 0xc51   :  { %v1196_v30 = vmul.f32 %v1194_v28, %v1162_v63 }
 0xc53   :  { %v1199_v31 = vmul.f32 %v1297_v13, %v1196_v30 }
 0xc55   :  { %v1202_v32 = vadd.f32 %v1298_v15, %v1199_v31 }
 0xc57   :  { %1204 = vst.msk [vmem:[%s1689_s4 + $0x8] sm:$0xff] %vm67_vm1, %v1202_v32 }
 0xc58   :  { %1209 = vsyncpa [#allocation3], 1 }

</bundles_post_ra>
